<compile_context>
chip_gen: v6e
topology: v6e:2x2x1
jax: 0.10.0
libtpu: 0.0.40
codegen_flags: <defaults>
</compile_context>

<pallas_src>
import numpy as np
import jax
import jax.numpy as jnp
from jax import lax
from jax.experimental import pallas as pl
from jax.experimental.pallas import tpu as pltpu


def seb_kernel(x1_ref, x2_ref, wexp_ref, bexp_ref, r_ref, mbd_ref,
               o_ref, conv_ref):
    # x1_ref  : (1, 1, th2, co_tile*2W)  VMEM  packed full-res skip (row tile)
    # x2_ref  : (1, Cin, H, W)           VMEM  low-res features (full, unpadded)
    # wexp_ref: (1, Cin*9, co_tile*W)    VMEM  per-tap weights, lane-expanded
    # bexp_ref: (1, 1, co_tile*W)        VMEM  bias, lane-expanded
    # r_ref   : (th2, H)                 VMEM  row-interp rows for this tile
    # mbd_ref : (co_tile*W, co_tile*2W)  VMEM  block-diag column interp
    # o_ref   : (1, 1, th2, co_tile*2W)  VMEM  packed output (row tile)
    # conv_ref: (H, co_tile*W)           VMEM scratch, persists across steps
    f32 = jnp.float32
    _, Cin, H, W = x2_ref.shape
    lanes_in = conv_ref.shape[1]
    co_tile = lanes_in // W

    # ---- 3x3 conv (stride 1, zero pad 1), channel-packed on lanes ----------
    # Computed once per (batch, co-tile); reused by every output-row tile.
    @pl.when(pl.program_id(2) == 0)
    def _():
        h_sub = lax.broadcasted_iota(jnp.int32, (H, W), 0)
        w_sub = lax.broadcasted_iota(jnp.int32, (H, W), 1)
        h_idx = jnp.concatenate([h_sub] * co_tile, axis=-1)   # (H, co_tile*W)
        w_idx = jnp.concatenate([w_sub] * co_tile, axis=-1)   # pos within W block

        # Zero-pad halo predicates, hoisted out of the ci / tap loops.
        def tap_ok(dy, dx):
            ok = None
            if dy > 0:
                ok = h_idx < H - dy
            elif dy < 0:
                ok = h_idx >= -dy
            if dx > 0:
                c = w_idx < W - dx
                ok = c if ok is None else ok & c
            elif dx < 0:
                c = w_idx >= -dx
                ok = c if ok is None else ok & c
            return ok

        masks = {(dy, dx): tap_ok(dy, dx)
                 for dy in (-1, 0, 1) for dx in (-1, 0, 1)}

        # Accumulator initialised with the broadcast bias (single packed slab).
        acc = jnp.broadcast_to(bexp_ref[0], (H, lanes_in)).astype(f32)

        for ci in range(Cin):
            x = x2_ref[0, ci].astype(f32)                       # (H, W)
            xt = jnp.concatenate([x] * co_tile, axis=-1)        # (H, co_tile*W)
            for ky in range(3):
                dy = ky - 1
                xr = xt if dy == 0 else pltpu.roll(xt, shift=(-dy) % H, axis=0)
                for kx in range(3):
                    dx = kx - 1
                    s = xr if dx == 0 else pltpu.roll(
                        xr, shift=(-dx) % lanes_in, axis=1)
                    ok = masks[(dy, dx)]
                    if ok is not None:
                        s = jnp.where(ok, s, 0.0)
                    wv = wexp_ref[0, ci * 9 + ky * 3 + kx][None, :]
                    acc = acc + wv * s
        conv_ref[...] = acc

    # ---- bilinear x2 upsample: two dense MXU matmuls + fuse with x1 --------
    u = jnp.dot(r_ref[...], conv_ref[...],
                preferred_element_type=f32)                     # (th2, co*W)
    u = jnp.dot(u, mbd_ref[...], preferred_element_type=f32)    # (th2, co*2W)
    o_ref[0, 0] = (x1_ref[0, 0].astype(f32) * u).astype(o_ref.dtype)


def _interp_matrix(out_size, in_size):
    """PyTorch align_corners=False bilinear (scale 2) as a dense matrix."""
    i = np.arange(out_size, dtype=np.float64)
    src = np.maximum((i + 0.5) * 0.5 - 0.5, 0.0)
    i0 = np.floor(src).astype(np.int64)
    frac = (src - i0).astype(np.float32)
    i1 = np.minimum(i0 + 1, in_size - 1)
    m = np.zeros((out_size, in_size), dtype=np.float32)
    m[np.arange(out_size), i0] += 1.0 - frac
    m[np.arange(out_size), i1] += frac
    return m


def _pick_row_tile(h2, cap=256):
    if h2 <= cap:
        return h2
    for t in range(cap, 7, -8):
        if h2 % t == 0:
            return t
    return h2


def seb_pallas(x1_nchw, x2_nchw, w_oihw, bias, *, co_tile=None, row_tile=None):
    """x1: (N, Cout, 2H, 2W), x2: (N, Cin, H, W), w: (Cout, Cin, 3, 3) OIHW."""
    N, Cout, H2, W2 = x1_nchw.shape
    N2, Cin, H, W = x2_nchw.shape
    assert N2 == N and H2 == 2 * H and W2 == 2 * W
    assert w_oihw.shape == (Cout, Cin, 3, 3)

    if co_tile is None:   # keep co_tile small (Cout is 8 in this model)
        co_tile = Cout if Cout <= 16 else max(
            d for d in (16, 8, 4, 2, 1) if Cout % d == 0)
    assert Cout % co_tile == 0
    n_co = Cout // co_tile

    th2 = row_tile if row_tile is not None else _pick_row_tile(H2)
    assert H2 % th2 == 0 and (th2 % 8 == 0 or th2 == H2)
    n_h = H2 // th2

    lanes_in = co_tile * W
    lanes_out = co_tile * W2

    # ---- constants hoisted out of the kernel (built once, tiny) ------------
    R = jnp.asarray(_interp_matrix(H2, H))                       # (2H, H)
    m_col = _interp_matrix(W2, W).T                              # (W, 2W)
    m_bd = jnp.asarray(np.kron(np.eye(co_tile, dtype=np.float32), m_col))

    wg = np.asarray(w_oihw, np.float32).reshape(n_co, co_tile, Cin, 9)
    wexp = np.repeat(wg.transpose(0, 2, 3, 1)[..., None], W, axis=-1)
    wexp = jnp.asarray(wexp.reshape(n_co, Cin * 9, lanes_in))
    bexp = np.repeat(np.asarray(bias, np.float32).reshape(n_co, co_tile, 1),
                     W, axis=-1)
    bexp = jnp.asarray(bexp.reshape(n_co, 1, lanes_in))

    # ---- lane-dense packed layout for x1 / out (layout plumbing only) ------
    x1p = x1_nchw.reshape(N, n_co, co_tile, H2, W2)
    x1p = jnp.transpose(x1p, (0, 1, 3, 2, 4)).reshape(N, n_co, H2, lanes_out)

    outp = pl.pallas_call(
        seb_kernel,
        out_shape=jax.ShapeDtypeStruct((N, n_co, H2, lanes_out), x1_nchw.dtype),
        grid_spec=pltpu.PrefetchScalarGridSpec(
            num_scalar_prefetch=0,
            grid=(N, n_co, n_h),
            in_specs=[
                pl.BlockSpec((1, 1, th2, lanes_out),
                             lambda n, c, h: (n, c, h, 0)),          # x1 packed
                pl.BlockSpec((1, Cin, H, W),
                             lambda n, c, h: (n, 0, 0, 0)),          # x2 (full)
                pl.BlockSpec((1, Cin * 9, lanes_in),
                             lambda n, c, h: (c, 0, 0)),             # weights
                pl.BlockSpec((1, 1, lanes_in),
                             lambda n, c, h: (c, 0, 0)),             # bias
                pl.BlockSpec((th2, H), lambda n, c, h: (h, 0)),      # R rows
                pl.BlockSpec((lanes_in, lanes_out),
                             lambda n, c, h: (0, 0)),                # M blkdiag
            ],
            out_specs=pl.BlockSpec((1, 1, th2, lanes_out),
                                   lambda n, c, h: (n, c, h, 0)),
            scratch_shapes=[pltpu.VMEM((H, lanes_in), jnp.float32)],
        ),
        compiler_params=pltpu.CompilerParams(
            dimension_semantics=("parallel", "parallel", "arbitrary")),
    )(x1p, x2_nchw, wexp, bexp, R, m_bd)

    out = outp.reshape(N, n_co, H2, co_tile, W2)
    return jnp.transpose(out, (0, 1, 3, 2, 4)).reshape(N, Cout, H2, W2)


# ----------------------- plain-JAX reference (for checking) -----------------
def _upsample2_bilinear_nchw(x):
    N, C, H, W = x.shape

    def idx_w(out_size, in_size):
        i = jnp.arange(out_size, dtype=jnp.float32)
        src = jnp.maximum(0.5 * (i + 0.5) - 0.5, 0.0)
        i0 = jnp.floor(src).astype(jnp.int32)
        i1 = jnp.minimum(i0 + 1, in_size - 1)
        return i0, i1, src - i0.astype(jnp.float32)

    i0, i1, wr = idx_w(2 * H, H)
    x = (x[:, :, i0, :] * (1.0 - wr)[None, None, :, None]
         + x[:, :, i1, :] * wr[None, None, :, None])
    j0, j1, wc = idx_w(2 * W, W)
    x = (x[:, :, :, j0] * (1.0 - wc)[None, None, None, :]
         + x[:, :, :, j1] * wc[None, None, None, :])
    return x


def seb_reference(x1, x2, w_oihw, bias):
    conv = lax.conv_general_dilated(
        x2, w_oihw, window_strides=(1, 1), padding=((1, 1), (1, 1)),
        dimension_numbers=("NCHW", "OIHW", "NCHW"))
    conv = conv + bias[None, :, None, None]
    return x1 * _upsample2_bilinear_nchw(conv)


if __name__ == "__main__":
    key = jax.random.PRNGKey(0)
    k1, k2, kw, kb = jax.random.split(key, 4)

    # SEB(in_channels=4, out_channels=8); forward input x = (x1, x2)
    N, Cin, Cout, H, W = 2, 4, 8, 8, 8
    x1 = jax.random.normal(k1, (N, Cout, 2 * H, 2 * W), dtype=jnp.float32)
    x2 = jax.random.normal(k2, (N, Cin, H, W), dtype=jnp.float32)
    w = 0.1 * jax.random.normal(kw, (Cout, Cin, 3, 3), dtype=jnp.float32)
    b = 0.1 * jax.random.normal(kb, (Cout,), dtype=jnp.float32)

    out = jax.block_until_ready(seb_pallas(x1, x2, w, b))
    ref = jax.block_until_ready(seb_reference(x1, x2, w, b))
    np.testing.assert_allclose(np.asarray(out), np.asarray(ref),
                               rtol=1e-4, atol=1e-4)
    print("KERNEL_OK")
</pallas_src>

<mosaic_0001>
module attributes {stable_mosaic.version = 11 : i64} {
  func.func @seb_kernel(%arg0: i32, %arg1: i32, %arg2: i32, %arg3: memref<1x1x16x128xf32, #tpu.memory_space<vmem>>, %arg4: memref<1x4x8x8xf32, #tpu.memory_space<vmem>>, %arg5: memref<1x36x64xf32, #tpu.memory_space<vmem>>, %arg6: memref<1x1x64xf32, #tpu.memory_space<vmem>>, %arg7: memref<16x8xf32, #tpu.memory_space<vmem>>, %arg8: memref<64x128xf32, #tpu.memory_space<vmem>>, %arg9: memref<1x1x16x128xf32, #tpu.memory_space<vmem>>, %arg10: memref<8x64xf32, #tpu.memory_space<vmem>>) attributes {dimension_semantics = [#tpu.dimension_semantics<parallel>, #tpu.dimension_semantics<parallel>, #tpu.dimension_semantics<arbitrary>], iteration_bounds = array<i64: 2, 1, 1>, scalar_prefetch = 0 : i64, scratch_operands = 1 : i64, tpu.core_type = #tpu.core_type<tc>, window_params = [{transform_indices = @transform_0, window_bounds = array<i64: 1, 1, 16, 128>}, {transform_indices = @transform_1, window_bounds = array<i64: 1, 4, 8, 8>}, {transform_indices = @transform_2, window_bounds = array<i64: 1, 36, 64>}, {transform_indices = @transform_3, window_bounds = array<i64: 1, 1, 64>}, {transform_indices = @transform_4, window_bounds = array<i64: 16, 8>}, {pipeline_mode = #tpu.pipeline_mode<synchronous>, transform_indices = @transform_5, window_bounds = array<i64: 64, 128>}, {transform_indices = @transform_6, window_bounds = array<i64: 1, 1, 16, 128>}]} {
    %c0_i32 = arith.constant 0 : i32
    %0 = arith.cmpi eq, %arg2, %c0_i32 : i32
    %1 = arith.extui %0 : i1 to i32
    %c0_i32_0 = arith.constant 0 : i32
    %2 = arith.cmpi ne, %1, %c0_i32_0 : i32
    scf.if %2 {
      %14 = tpu.iota {dimensions = array<i32: 0>} : vector<8x8xi32>
      %15 = tpu.iota {dimensions = array<i32: 1>} : vector<8x8xi32>
      %16 = tpu.concatenate %14, %14, %14, %14, %14, %14, %14, %14 in 1 : vector<8x8xi32>, vector<8x8xi32>, vector<8x8xi32>, vector<8x8xi32>, vector<8x8xi32>, vector<8x8xi32>, vector<8x8xi32>, vector<8x8xi32> -> vector<8x64xi32>
      %17 = tpu.concatenate %15, %15, %15, %15, %15, %15, %15, %15 in 1 : vector<8x8xi32>, vector<8x8xi32>, vector<8x8xi32>, vector<8x8xi32>, vector<8x8xi32>, vector<8x8xi32>, vector<8x8xi32>, vector<8x8xi32> -> vector<8x64xi32>
      %c1_i32 = arith.constant 1 : i32
      %18 = vector.broadcast %c1_i32 : i32 to vector<8x64xi32>
      %19 = arith.cmpi sge, %16, %18 : vector<8x64xi32>
      %c1_i32_15 = arith.constant 1 : i32
      %20 = vector.broadcast %c1_i32_15 : i32 to vector<8x64xi32>
      %21 = arith.cmpi sge, %17, %20 : vector<8x64xi32>
      %22 = arith.andi %19, %21 : vector<8x64xi1>
      %c1_i32_16 = arith.constant 1 : i32
      %23 = vector.broadcast %c1_i32_16 : i32 to vector<8x64xi32>
      %24 = arith.cmpi sge, %16, %23 : vector<8x64xi32>
      %c1_i32_17 = arith.constant 1 : i32
      %25 = vector.broadcast %c1_i32_17 : i32 to vector<8x64xi32>
      %26 = arith.cmpi sge, %16, %25 : vector<8x64xi32>
      %c7_i32 = arith.constant 7 : i32
      %27 = vector.broadcast %c7_i32 : i32 to vector<8x64xi32>
      %28 = arith.cmpi slt, %17, %27 : vector<8x64xi32>
      %29 = arith.andi %26, %28 : vector<8x64xi1>
      %c1_i32_18 = arith.constant 1 : i32
      %30 = vector.broadcast %c1_i32_18 : i32 to vector<8x64xi32>
      %31 = arith.cmpi sge, %17, %30 : vector<8x64xi32>
      %c7_i32_19 = arith.constant 7 : i32
      %32 = vector.broadcast %c7_i32_19 : i32 to vector<8x64xi32>
      %33 = arith.cmpi slt, %17, %32 : vector<8x64xi32>
      %c7_i32_20 = arith.constant 7 : i32
      %34 = vector.broadcast %c7_i32_20 : i32 to vector<8x64xi32>
      %35 = arith.cmpi slt, %16, %34 : vector<8x64xi32>
      %c1_i32_21 = arith.constant 1 : i32
      %36 = vector.broadcast %c1_i32_21 : i32 to vector<8x64xi32>
      %37 = arith.cmpi sge, %17, %36 : vector<8x64xi32>
      %38 = arith.andi %35, %37 : vector<8x64xi1>
      %c7_i32_22 = arith.constant 7 : i32
      %39 = vector.broadcast %c7_i32_22 : i32 to vector<8x64xi32>
      %40 = arith.cmpi slt, %16, %39 : vector<8x64xi32>
      %c7_i32_23 = arith.constant 7 : i32
      %41 = vector.broadcast %c7_i32_23 : i32 to vector<8x64xi32>
      %42 = arith.cmpi slt, %16, %41 : vector<8x64xi32>
      %c7_i32_24 = arith.constant 7 : i32
      %43 = vector.broadcast %c7_i32_24 : i32 to vector<8x64xi32>
      %44 = arith.cmpi slt, %17, %43 : vector<8x64xi32>
      %45 = arith.andi %42, %44 : vector<8x64xi1>
      %c0_25 = arith.constant 0 : index
      %c0_26 = arith.constant 0 : index
      %c0_27 = arith.constant 0 : index
      %46 = vector.load %arg6[%c0_25, %c0_26, %c0_27] : memref<1x1x64xf32, #tpu.memory_space<vmem>>, vector<1x1x64xf32>
      %47 = vector.shape_cast %46 : vector<1x1x64xf32> to vector<1x64xf32>
      %48 = vector.shape_cast %47 : vector<1x64xf32> to vector<1x64xf32>
      %49 = vector.broadcast %48 : vector<1x64xf32> to vector<8x64xf32>
      %c0_28 = arith.constant 0 : index
      %c0_29 = arith.constant 0 : index
      %c0_30 = arith.constant 0 : index
      %c0_31 = arith.constant 0 : index
      %50 = vector.load %arg4[%c0_28, %c0_29, %c0_30, %c0_31] : memref<1x4x8x8xf32, #tpu.memory_space<vmem>>, vector<1x1x8x8xf32>
      %51 = vector.shape_cast %50 : vector<1x1x8x8xf32> to vector<8x8xf32>
      %52 = tpu.concatenate %51, %51, %51, %51, %51, %51, %51, %51 in 1 : vector<8x8xf32>, vector<8x8xf32>, vector<8x8xf32>, vector<8x8xf32>, vector<8x8xf32>, vector<8x8xf32>, vector<8x8xf32>, vector<8x8xf32> -> vector<8x64xf32>
      %c1_i32_32 = arith.constant 1 : i32
      %53 = tpu.dynamic_rotate %52 by %c1_i32_32 dim 0 : vector<8x64xf32>, i32 -> vector<8x64xf32>
      %c1_i32_33 = arith.constant 1 : i32
      %54 = tpu.dynamic_rotate %53 by %c1_i32_33 dim 1 : vector<8x64xf32>, i32 -> vector<8x64xf32>
      %cst_34 = arith.constant 0.000000e+00 : f32
      %55 = vector.broadcast %cst_34 : f32 to vector<8x64xf32>
      %56 = arith.select %22, %54, %55 : vector<8x64xi1>, vector<8x64xf32>
      %c0_35 = arith.constant 0 : index
      %c0_36 = arith.constant 0 : index
      %c0_37 = arith.constant 0 : index
      %57 = vector.load %arg5[%c0_35, %c0_36, %c0_37] : memref<1x36x64xf32, #tpu.memory_space<vmem>>, vector<1x1x64xf32>
      %58 = vector.shape_cast %57 : vector<1x1x64xf32> to vector<64xf32>
      %59 = vector.shape_cast %58 : vector<64xf32> to vector<1x64xf32>
      %60 = vector.broadcast %59 : vector<1x64xf32> to vector<8x64xf32>
      %61 = arith.mulf %60, %56 : vector<8x64xf32>
      %62 = arith.addf %49, %61 : vector<8x64xf32>
      %cst_38 = arith.constant 0.000000e+00 : f32
      %63 = vector.broadcast %cst_38 : f32 to vector<8x64xf32>
      %64 = arith.select %24, %53, %63 : vector<8x64xi1>, vector<8x64xf32>
      %c0_39 = arith.constant 0 : index
      %c1 = arith.constant 1 : index
      %c0_40 = arith.constant 0 : index
      %65 = vector.load %arg5[%c0_39, %c1, %c0_40] : memref<1x36x64xf32, #tpu.memory_space<vmem>>, vector<1x1x64xf32>
      %66 = vector.shape_cast %65 : vector<1x1x64xf32> to vector<64xf32>
      %67 = vector.shape_cast %66 : vector<64xf32> to vector<1x64xf32>
      %68 = vector.broadcast %67 : vector<1x64xf32> to vector<8x64xf32>
      %69 = arith.mulf %68, %64 : vector<8x64xf32>
      %70 = arith.addf %62, %69 : vector<8x64xf32>
      %c63_i32 = arith.constant 63 : i32
      %71 = tpu.dynamic_rotate %53 by %c63_i32 dim 1 : vector<8x64xf32>, i32 -> vector<8x64xf32>
      %cst_41 = arith.constant 0.000000e+00 : f32
      %72 = vector.broadcast %cst_41 : f32 to vector<8x64xf32>
      %73 = arith.select %29, %71, %72 : vector<8x64xi1>, vector<8x64xf32>
      %c0_42 = arith.constant 0 : index
      %c2 = arith.constant 2 : index
      %c0_43 = arith.constant 0 : index
      %74 = vector.load %arg5[%c0_42, %c2, %c0_43] : memref<1x36x64xf32, #tpu.memory_space<vmem>>, vector<1x1x64xf32>
      %75 = vector.shape_cast %74 : vector<1x1x64xf32> to vector<64xf32>
      %76 = vector.shape_cast %75 : vector<64xf32> to vector<1x64xf32>
      %77 = vector.broadcast %76 : vector<1x64xf32> to vector<8x64xf32>
      %78 = arith.mulf %77, %73 : vector<8x64xf32>
      %79 = arith.addf %70, %78 : vector<8x64xf32>
      %c1_i32_44 = arith.constant 1 : i32
      %80 = tpu.dynamic_rotate %52 by %c1_i32_44 dim 1 : vector<8x64xf32>, i32 -> vector<8x64xf32>
      %cst_45 = arith.constant 0.000000e+00 : f32
      %81 = vector.broadcast %cst_45 : f32 to vector<8x64xf32>
      %82 = arith.select %31, %80, %81 : vector<8x64xi1>, vector<8x64xf32>
      %c0_46 = arith.constant 0 : index
      %c3 = arith.constant 3 : index
      %c0_47 = arith.constant 0 : index
      %83 = vector.load %arg5[%c0_46, %c3, %c0_47] : memref<1x36x64xf32, #tpu.memory_space<vmem>>, vector<1x1x64xf32>
      %84 = vector.shape_cast %83 : vector<1x1x64xf32> to vector<64xf32>
      %85 = vector.shape_cast %84 : vector<64xf32> to vector<1x64xf32>
      %86 = vector.broadcast %85 : vector<1x64xf32> to vector<8x64xf32>
      %87 = arith.mulf %86, %82 : vector<8x64xf32>
      %88 = arith.addf %79, %87 : vector<8x64xf32>
      %c0_48 = arith.constant 0 : index
      %c4 = arith.constant 4 : index
      %c0_49 = arith.constant 0 : index
      %89 = vector.load %arg5[%c0_48, %c4, %c0_49] : memref<1x36x64xf32, #tpu.memory_space<vmem>>, vector<1x1x64xf32>
      %90 = vector.shape_cast %89 : vector<1x1x64xf32> to vector<64xf32>
      %91 = vector.shape_cast %90 : vector<64xf32> to vector<1x64xf32>
      %92 = vector.broadcast %91 : vector<1x64xf32> to vector<8x64xf32>
      %93 = arith.mulf %92, %52 : vector<8x64xf32>
      %94 = arith.addf %88, %93 : vector<8x64xf32>
      %c63_i32_50 = arith.constant 63 : i32
      %95 = tpu.dynamic_rotate %52 by %c63_i32_50 dim 1 : vector<8x64xf32>, i32 -> vector<8x64xf32>
      %cst_51 = arith.constant 0.000000e+00 : f32
      %96 = vector.broadcast %cst_51 : f32 to vector<8x64xf32>
      %97 = arith.select %33, %95, %96 : vector<8x64xi1>, vector<8x64xf32>
      %c0_52 = arith.constant 0 : index
      %c5 = arith.constant 5 : index
      %c0_53 = arith.constant 0 : index
      %98 = vector.load %arg5[%c0_52, %c5, %c0_53] : memref<1x36x64xf32, #tpu.memory_space<vmem>>, vector<1x1x64xf32>
      %99 = vector.shape_cast %98 : vector<1x1x64xf32> to vector<64xf32>
      %100 = vector.shape_cast %99 : vector<64xf32> to vector<1x64xf32>
      %101 = vector.broadcast %100 : vector<1x64xf32> to vector<8x64xf32>
      %102 = arith.mulf %101, %97 : vector<8x64xf32>
      %103 = arith.addf %94, %102 : vector<8x64xf32>
      %c7_i32_54 = arith.constant 7 : i32
      %104 = tpu.dynamic_rotate %52 by %c7_i32_54 dim 0 : vector<8x64xf32>, i32 -> vector<8x64xf32>
      %c1_i32_55 = arith.constant 1 : i32
      %105 = tpu.dynamic_rotate %104 by %c1_i32_55 dim 1 : vector<8x64xf32>, i32 -> vector<8x64xf32>
      %cst_56 = arith.constant 0.000000e+00 : f32
      %106 = vector.broadcast %cst_56 : f32 to vector<8x64xf32>
      %107 = arith.select %38, %105, %106 : vector<8x64xi1>, vector<8x64xf32>
      %c0_57 = arith.constant 0 : index
      %c6 = arith.constant 6 : index
      %c0_58 = arith.constant 0 : index
      %108 = vector.load %arg5[%c0_57, %c6, %c0_58] : memref<1x36x64xf32, #tpu.memory_space<vmem>>, vector<1x1x64xf32>
      %109 = vector.shape_cast %108 : vector<1x1x64xf32> to vector<64xf32>
      %110 = vector.shape_cast %109 : vector<64xf32> to vector<1x64xf32>
      %111 = vector.broadcast %110 : vector<1x64xf32> to vector<8x64xf32>
      %112 = arith.mulf %111, %107 : vector<8x64xf32>
      %113 = arith.addf %103, %112 : vector<8x64xf32>
      %cst_59 = arith.constant 0.000000e+00 : f32
      %114 = vector.broadcast %cst_59 : f32 to vector<8x64xf32>
      %115 = arith.select %40, %104, %114 : vector<8x64xi1>, vector<8x64xf32>
      %c0_60 = arith.constant 0 : index
      %c7 = arith.constant 7 : index
      %c0_61 = arith.constant 0 : index
      %116 = vector.load %arg5[%c0_60, %c7, %c0_61] : memref<1x36x64xf32, #tpu.memory_space<vmem>>, vector<1x1x64xf32>
      %117 = vector.shape_cast %116 : vector<1x1x64xf32> to vector<64xf32>
      %118 = vector.shape_cast %117 : vector<64xf32> to vector<1x64xf32>
      %119 = vector.broadcast %118 : vector<1x64xf32> to vector<8x64xf32>
      %120 = arith.mulf %119, %115 : vector<8x64xf32>
      %121 = arith.addf %113, %120 : vector<8x64xf32>
      %c63_i32_62 = arith.constant 63 : i32
      %122 = tpu.dynamic_rotate %104 by %c63_i32_62 dim 1 : vector<8x64xf32>, i32 -> vector<8x64xf32>
      %cst_63 = arith.constant 0.000000e+00 : f32
      %123 = vector.broadcast %cst_63 : f32 to vector<8x64xf32>
      %124 = arith.select %45, %122, %123 : vector<8x64xi1>, vector<8x64xf32>
      %c0_64 = arith.constant 0 : index
      %c8 = arith.constant 8 : index
      %c0_65 = arith.constant 0 : index
      %125 = vector.load %arg5[%c0_64, %c8, %c0_65] : memref<1x36x64xf32, #tpu.memory_space<vmem>>, vector<1x1x64xf32>
      %126 = vector.shape_cast %125 : vector<1x1x64xf32> to vector<64xf32>
      %127 = vector.shape_cast %126 : vector<64xf32> to vector<1x64xf32>
      %128 = vector.broadcast %127 : vector<1x64xf32> to vector<8x64xf32>
      %129 = arith.mulf %128, %124 : vector<8x64xf32>
      %130 = arith.addf %121, %129 : vector<8x64xf32>
      %c0_66 = arith.constant 0 : index
      %c1_67 = arith.constant 1 : index
      %c0_68 = arith.constant 0 : index
      %c0_69 = arith.constant 0 : index
      %131 = vector.load %arg4[%c0_66, %c1_67, %c0_68, %c0_69] : memref<1x4x8x8xf32, #tpu.memory_space<vmem>>, vector<1x1x8x8xf32>
      %132 = vector.shape_cast %131 : vector<1x1x8x8xf32> to vector<8x8xf32>
      %133 = tpu.concatenate %132, %132, %132, %132, %132, %132, %132, %132 in 1 : vector<8x8xf32>, vector<8x8xf32>, vector<8x8xf32>, vector<8x8xf32>, vector<8x8xf32>, vector<8x8xf32>, vector<8x8xf32>, vector<8x8xf32> -> vector<8x64xf32>
      %c1_i32_70 = arith.constant 1 : i32
      %134 = tpu.dynamic_rotate %133 by %c1_i32_70 dim 0 : vector<8x64xf32>, i32 -> vector<8x64xf32>
      %c1_i32_71 = arith.constant 1 : i32
      %135 = tpu.dynamic_rotate %134 by %c1_i32_71 dim 1 : vector<8x64xf32>, i32 -> vector<8x64xf32>
      %cst_72 = arith.constant 0.000000e+00 : f32
      %136 = vector.broadcast %cst_72 : f32 to vector<8x64xf32>
      %137 = arith.select %22, %135, %136 : vector<8x64xi1>, vector<8x64xf32>
      %c0_73 = arith.constant 0 : index
      %c9 = arith.constant 9 : index
      %c0_74 = arith.constant 0 : index
      %138 = vector.load %arg5[%c0_73, %c9, %c0_74] : memref<1x36x64xf32, #tpu.memory_space<vmem>>, vector<1x1x64xf32>
      %139 = vector.shape_cast %138 : vector<1x1x64xf32> to vector<64xf32>
      %140 = vector.shape_cast %139 : vector<64xf32> to vector<1x64xf32>
      %141 = vector.broadcast %140 : vector<1x64xf32> to vector<8x64xf32>
      %142 = arith.mulf %141, %137 : vector<8x64xf32>
      %143 = arith.addf %130, %142 : vector<8x64xf32>
      %cst_75 = arith.constant 0.000000e+00 : f32
      %144 = vector.broadcast %cst_75 : f32 to vector<8x64xf32>
      %145 = arith.select %24, %134, %144 : vector<8x64xi1>, vector<8x64xf32>
      %c0_76 = arith.constant 0 : index
      %c10 = arith.constant 10 : index
      %c0_77 = arith.constant 0 : index
      %146 = vector.load %arg5[%c0_76, %c10, %c0_77] : memref<1x36x64xf32, #tpu.memory_space<vmem>>, vector<1x1x64xf32>
      %147 = vector.shape_cast %146 : vector<1x1x64xf32> to vector<64xf32>
      %148 = vector.shape_cast %147 : vector<64xf32> to vector<1x64xf32>
      %149 = vector.broadcast %148 : vector<1x64xf32> to vector<8x64xf32>
      %150 = arith.mulf %149, %145 : vector<8x64xf32>
      %151 = arith.addf %143, %150 : vector<8x64xf32>
      %c63_i32_78 = arith.constant 63 : i32
      %152 = tpu.dynamic_rotate %134 by %c63_i32_78 dim 1 : vector<8x64xf32>, i32 -> vector<8x64xf32>
      %cst_79 = arith.constant 0.000000e+00 : f32
      %153 = vector.broadcast %cst_79 : f32 to vector<8x64xf32>
      %154 = arith.select %29, %152, %153 : vector<8x64xi1>, vector<8x64xf32>
      %c0_80 = arith.constant 0 : index
      %c11 = arith.constant 11 : index
      %c0_81 = arith.constant 0 : index
      %155 = vector.load %arg5[%c0_80, %c11, %c0_81] : memref<1x36x64xf32, #tpu.memory_space<vmem>>, vector<1x1x64xf32>
      %156 = vector.shape_cast %155 : vector<1x1x64xf32> to vector<64xf32>
      %157 = vector.shape_cast %156 : vector<64xf32> to vector<1x64xf32>
      %158 = vector.broadcast %157 : vector<1x64xf32> to vector<8x64xf32>
      %159 = arith.mulf %158, %154 : vector<8x64xf32>
      %160 = arith.addf %151, %159 : vector<8x64xf32>
      %c1_i32_82 = arith.constant 1 : i32
      %161 = tpu.dynamic_rotate %133 by %c1_i32_82 dim 1 : vector<8x64xf32>, i32 -> vector<8x64xf32>
      %cst_83 = arith.constant 0.000000e+00 : f32
      %162 = vector.broadcast %cst_83 : f32 to vector<8x64xf32>
      %163 = arith.select %31, %161, %162 : vector<8x64xi1>, vector<8x64xf32>
      %c0_84 = arith.constant 0 : index
      %c12 = arith.constant 12 : index
      %c0_85 = arith.constant 0 : index
      %164 = vector.load %arg5[%c0_84, %c12, %c0_85] : memref<1x36x64xf32, #tpu.memory_space<vmem>>, vector<1x1x64xf32>
      %165 = vector.shape_cast %164 : vector<1x1x64xf32> to vector<64xf32>
      %166 = vector.shape_cast %165 : vector<64xf32> to vector<1x64xf32>
      %167 = vector.broadcast %166 : vector<1x64xf32> to vector<8x64xf32>
      %168 = arith.mulf %167, %163 : vector<8x64xf32>
      %169 = arith.addf %160, %168 : vector<8x64xf32>
      %c0_86 = arith.constant 0 : index
      %c13 = arith.constant 13 : index
      %c0_87 = arith.constant 0 : index
      %170 = vector.load %arg5[%c0_86, %c13, %c0_87] : memref<1x36x64xf32, #tpu.memory_space<vmem>>, vector<1x1x64xf32>
      %171 = vector.shape_cast %170 : vector<1x1x64xf32> to vector<64xf32>
      %172 = vector.shape_cast %171 : vector<64xf32> to vector<1x64xf32>
      %173 = vector.broadcast %172 : vector<1x64xf32> to vector<8x64xf32>
      %174 = arith.mulf %173, %133 : vector<8x64xf32>
      %175 = arith.addf %169, %174 : vector<8x64xf32>
      %c63_i32_88 = arith.constant 63 : i32
      %176 = tpu.dynamic_rotate %133 by %c63_i32_88 dim 1 : vector<8x64xf32>, i32 -> vector<8x64xf32>
      %cst_89 = arith.constant 0.000000e+00 : f32
      %177 = vector.broadcast %cst_89 : f32 to vector<8x64xf32>
      %178 = arith.select %33, %176, %177 : vector<8x64xi1>, vector<8x64xf32>
      %c0_90 = arith.constant 0 : index
      %c14 = arith.constant 14 : index
      %c0_91 = arith.constant 0 : index
      %179 = vector.load %arg5[%c0_90, %c14, %c0_91] : memref<1x36x64xf32, #tpu.memory_space<vmem>>, vector<1x1x64xf32>
      %180 = vector.shape_cast %179 : vector<1x1x64xf32> to vector<64xf32>
      %181 = vector.shape_cast %180 : vector<64xf32> to vector<1x64xf32>
      %182 = vector.broadcast %181 : vector<1x64xf32> to vector<8x64xf32>
      %183 = arith.mulf %182, %178 : vector<8x64xf32>
      %184 = arith.addf %175, %183 : vector<8x64xf32>
      %c7_i32_92 = arith.constant 7 : i32
      %185 = tpu.dynamic_rotate %133 by %c7_i32_92 dim 0 : vector<8x64xf32>, i32 -> vector<8x64xf32>
      %c1_i32_93 = arith.constant 1 : i32
      %186 = tpu.dynamic_rotate %185 by %c1_i32_93 dim 1 : vector<8x64xf32>, i32 -> vector<8x64xf32>
      %cst_94 = arith.constant 0.000000e+00 : f32
      %187 = vector.broadcast %cst_94 : f32 to vector<8x64xf32>
      %188 = arith.select %38, %186, %187 : vector<8x64xi1>, vector<8x64xf32>
      %c0_95 = arith.constant 0 : index
      %c15 = arith.constant 15 : index
      %c0_96 = arith.constant 0 : index
      %189 = vector.load %arg5[%c0_95, %c15, %c0_96] : memref<1x36x64xf32, #tpu.memory_space<vmem>>, vector<1x1x64xf32>
      %190 = vector.shape_cast %189 : vector<1x1x64xf32> to vector<64xf32>
      %191 = vector.shape_cast %190 : vector<64xf32> to vector<1x64xf32>
      %192 = vector.broadcast %191 : vector<1x64xf32> to vector<8x64xf32>
      %193 = arith.mulf %192, %188 : vector<8x64xf32>
      %194 = arith.addf %184, %193 : vector<8x64xf32>
      %cst_97 = arith.constant 0.000000e+00 : f32
      %195 = vector.broadcast %cst_97 : f32 to vector<8x64xf32>
      %196 = arith.select %40, %185, %195 : vector<8x64xi1>, vector<8x64xf32>
      %c0_98 = arith.constant 0 : index
      %c16 = arith.constant 16 : index
      %c0_99 = arith.constant 0 : index
      %197 = vector.load %arg5[%c0_98, %c16, %c0_99] : memref<1x36x64xf32, #tpu.memory_space<vmem>>, vector<1x1x64xf32>
      %198 = vector.shape_cast %197 : vector<1x1x64xf32> to vector<64xf32>
      %199 = vector.shape_cast %198 : vector<64xf32> to vector<1x64xf32>
      %200 = vector.broadcast %199 : vector<1x64xf32> to vector<8x64xf32>
      %201 = arith.mulf %200, %196 : vector<8x64xf32>
      %202 = arith.addf %194, %201 : vector<8x64xf32>
      %c63_i32_100 = arith.constant 63 : i32
      %203 = tpu.dynamic_rotate %185 by %c63_i32_100 dim 1 : vector<8x64xf32>, i32 -> vector<8x64xf32>
      %cst_101 = arith.constant 0.000000e+00 : f32
      %204 = vector.broadcast %cst_101 : f32 to vector<8x64xf32>
      %205 = arith.select %45, %203, %204 : vector<8x64xi1>, vector<8x64xf32>
      %c0_102 = arith.constant 0 : index
      %c17 = arith.constant 17 : index
      %c0_103 = arith.constant 0 : index
      %206 = vector.load %arg5[%c0_102, %c17, %c0_103] : memref<1x36x64xf32, #tpu.memory_space<vmem>>, vector<1x1x64xf32>
      %207 = vector.shape_cast %206 : vector<1x1x64xf32> to vector<64xf32>
      %208 = vector.shape_cast %207 : vector<64xf32> to vector<1x64xf32>
      %209 = vector.broadcast %208 : vector<1x64xf32> to vector<8x64xf32>
      %210 = arith.mulf %209, %205 : vector<8x64xf32>
      %211 = arith.addf %202, %210 : vector<8x64xf32>
      %c0_104 = arith.constant 0 : index
      %c2_105 = arith.constant 2 : index
      %c0_106 = arith.constant 0 : index
      %c0_107 = arith.constant 0 : index
      %212 = vector.load %arg4[%c0_104, %c2_105, %c0_106, %c0_107] : memref<1x4x8x8xf32, #tpu.memory_space<vmem>>, vector<1x1x8x8xf32>
      %213 = vector.shape_cast %212 : vector<1x1x8x8xf32> to vector<8x8xf32>
      %214 = tpu.concatenate %213, %213, %213, %213, %213, %213, %213, %213 in 1 : vector<8x8xf32>, vector<8x8xf32>, vector<8x8xf32>, vector<8x8xf32>, vector<8x8xf32>, vector<8x8xf32>, vector<8x8xf32>, vector<8x8xf32> -> vector<8x64xf32>
      %c1_i32_108 = arith.constant 1 : i32
      %215 = tpu.dynamic_rotate %214 by %c1_i32_108 dim 0 : vector<8x64xf32>, i32 -> vector<8x64xf32>
      %c1_i32_109 = arith.constant 1 : i32
      %216 = tpu.dynamic_rotate %215 by %c1_i32_109 dim 1 : vector<8x64xf32>, i32 -> vector<8x64xf32>
      %cst_110 = arith.constant 0.000000e+00 : f32
      %217 = vector.broadcast %cst_110 : f32 to vector<8x64xf32>
      %218 = arith.select %22, %216, %217 : vector<8x64xi1>, vector<8x64xf32>
      %c0_111 = arith.constant 0 : index
      %c18 = arith.constant 18 : index
      %c0_112 = arith.constant 0 : index
      %219 = vector.load %arg5[%c0_111, %c18, %c0_112] : memref<1x36x64xf32, #tpu.memory_space<vmem>>, vector<1x1x64xf32>
      %220 = vector.shape_cast %219 : vector<1x1x64xf32> to vector<64xf32>
      %221 = vector.shape_cast %220 : vector<64xf32> to vector<1x64xf32>
      %222 = vector.broadcast %221 : vector<1x64xf32> to vector<8x64xf32>
      %223 = arith.mulf %222, %218 : vector<8x64xf32>
      %224 = arith.addf %211, %223 : vector<8x64xf32>
      %cst_113 = arith.constant 0.000000e+00 : f32
      %225 = vector.broadcast %cst_113 : f32 to vector<8x64xf32>
      %226 = arith.select %24, %215, %225 : vector<8x64xi1>, vector<8x64xf32>
      %c0_114 = arith.constant 0 : index
      %c19 = arith.constant 19 : index
      %c0_115 = arith.constant 0 : index
      %227 = vector.load %arg5[%c0_114, %c19, %c0_115] : memref<1x36x64xf32, #tpu.memory_space<vmem>>, vector<1x1x64xf32>
      %228 = vector.shape_cast %227 : vector<1x1x64xf32> to vector<64xf32>
      %229 = vector.shape_cast %228 : vector<64xf32> to vector<1x64xf32>
      %230 = vector.broadcast %229 : vector<1x64xf32> to vector<8x64xf32>
      %231 = arith.mulf %230, %226 : vector<8x64xf32>
      %232 = arith.addf %224, %231 : vector<8x64xf32>
      %c63_i32_116 = arith.constant 63 : i32
      %233 = tpu.dynamic_rotate %215 by %c63_i32_116 dim 1 : vector<8x64xf32>, i32 -> vector<8x64xf32>
      %cst_117 = arith.constant 0.000000e+00 : f32
      %234 = vector.broadcast %cst_117 : f32 to vector<8x64xf32>
      %235 = arith.select %29, %233, %234 : vector<8x64xi1>, vector<8x64xf32>
      %c0_118 = arith.constant 0 : index
      %c20 = arith.constant 20 : index
      %c0_119 = arith.constant 0 : index
      %236 = vector.load %arg5[%c0_118, %c20, %c0_119] : memref<1x36x64xf32, #tpu.memory_space<vmem>>, vector<1x1x64xf32>
      %237 = vector.shape_cast %236 : vector<1x1x64xf32> to vector<64xf32>
      %238 = vector.shape_cast %237 : vector<64xf32> to vector<1x64xf32>
      %239 = vector.broadcast %238 : vector<1x64xf32> to vector<8x64xf32>
      %240 = arith.mulf %239, %235 : vector<8x64xf32>
      %241 = arith.addf %232, %240 : vector<8x64xf32>
      %c1_i32_120 = arith.constant 1 : i32
      %242 = tpu.dynamic_rotate %214 by %c1_i32_120 dim 1 : vector<8x64xf32>, i32 -> vector<8x64xf32>
      %cst_121 = arith.constant 0.000000e+00 : f32
      %243 = vector.broadcast %cst_121 : f32 to vector<8x64xf32>
      %244 = arith.select %31, %242, %243 : vector<8x64xi1>, vector<8x64xf32>
      %c0_122 = arith.constant 0 : index
      %c21 = arith.constant 21 : index
      %c0_123 = arith.constant 0 : index
      %245 = vector.load %arg5[%c0_122, %c21, %c0_123] : memref<1x36x64xf32, #tpu.memory_space<vmem>>, vector<1x1x64xf32>
      %246 = vector.shape_cast %245 : vector<1x1x64xf32> to vector<64xf32>
      %247 = vector.shape_cast %246 : vector<64xf32> to vector<1x64xf32>
      %248 = vector.broadcast %247 : vector<1x64xf32> to vector<8x64xf32>
      %249 = arith.mulf %248, %244 : vector<8x64xf32>
      %250 = arith.addf %241, %249 : vector<8x64xf32>
      %c0_124 = arith.constant 0 : index
      %c22 = arith.constant 22 : index
      %c0_125 = arith.constant 0 : index
      %251 = vector.load %arg5[%c0_124, %c22, %c0_125] : memref<1x36x64xf32, #tpu.memory_space<vmem>>, vector<1x1x64xf32>
      %252 = vector.shape_cast %251 : vector<1x1x64xf32> to vector<64xf32>
      %253 = vector.shape_cast %252 : vector<64xf32> to vector<1x64xf32>
      %254 = vector.broadcast %253 : vector<1x64xf32> to vector<8x64xf32>
      %255 = arith.mulf %254, %214 : vector<8x64xf32>
      %256 = arith.addf %250, %255 : vector<8x64xf32>
      %c63_i32_126 = arith.constant 63 : i32
      %257 = tpu.dynamic_rotate %214 by %c63_i32_126 dim 1 : vector<8x64xf32>, i32 -> vector<8x64xf32>
      %cst_127 = arith.constant 0.000000e+00 : f32
      %258 = vector.broadcast %cst_127 : f32 to vector<8x64xf32>
      %259 = arith.select %33, %257, %258 : vector<8x64xi1>, vector<8x64xf32>
      %c0_128 = arith.constant 0 : index
      %c23 = arith.constant 23 : index
      %c0_129 = arith.constant 0 : index
      %260 = vector.load %arg5[%c0_128, %c23, %c0_129] : memref<1x36x64xf32, #tpu.memory_space<vmem>>, vector<1x1x64xf32>
      %261 = vector.shape_cast %260 : vector<1x1x64xf32> to vector<64xf32>
      %262 = vector.shape_cast %261 : vector<64xf32> to vector<1x64xf32>
      %263 = vector.broadcast %262 : vector<1x64xf32> to vector<8x64xf32>
      %264 = arith.mulf %263, %259 : vector<8x64xf32>
      %265 = arith.addf %256, %264 : vector<8x64xf32>
      %c7_i32_130 = arith.constant 7 : i32
      %266 = tpu.dynamic_rotate %214 by %c7_i32_130 dim 0 : vector<8x64xf32>, i32 -> vector<8x64xf32>
      %c1_i32_131 = arith.constant 1 : i32
      %267 = tpu.dynamic_rotate %266 by %c1_i32_131 dim 1 : vector<8x64xf32>, i32 -> vector<8x64xf32>
      %cst_132 = arith.constant 0.000000e+00 : f32
      %268 = vector.broadcast %cst_132 : f32 to vector<8x64xf32>
      %269 = arith.select %38, %267, %268 : vector<8x64xi1>, vector<8x64xf32>
      %c0_133 = arith.constant 0 : index
      %c24 = arith.constant 24 : index
      %c0_134 = arith.constant 0 : index
      %270 = vector.load %arg5[%c0_133, %c24, %c0_134] : memref<1x36x64xf32, #tpu.memory_space<vmem>>, vector<1x1x64xf32>
      %271 = vector.shape_cast %270 : vector<1x1x64xf32> to vector<64xf32>
      %272 = vector.shape_cast %271 : vector<64xf32> to vector<1x64xf32>
      %273 = vector.broadcast %272 : vector<1x64xf32> to vector<8x64xf32>
      %274 = arith.mulf %273, %269 : vector<8x64xf32>
      %275 = arith.addf %265, %274 : vector<8x64xf32>
      %cst_135 = arith.constant 0.000000e+00 : f32
      %276 = vector.broadcast %cst_135 : f32 to vector<8x64xf32>
      %277 = arith.select %40, %266, %276 : vector<8x64xi1>, vector<8x64xf32>
      %c0_136 = arith.constant 0 : index
      %c25 = arith.constant 25 : index
      %c0_137 = arith.constant 0 : index
      %278 = vector.load %arg5[%c0_136, %c25, %c0_137] : memref<1x36x64xf32, #tpu.memory_space<vmem>>, vector<1x1x64xf32>
      %279 = vector.shape_cast %278 : vector<1x1x64xf32> to vector<64xf32>
      %280 = vector.shape_cast %279 : vector<64xf32> to vector<1x64xf32>
      %281 = vector.broadcast %280 : vector<1x64xf32> to vector<8x64xf32>
      %282 = arith.mulf %281, %277 : vector<8x64xf32>
      %283 = arith.addf %275, %282 : vector<8x64xf32>
      %c63_i32_138 = arith.constant 63 : i32
      %284 = tpu.dynamic_rotate %266 by %c63_i32_138 dim 1 : vector<8x64xf32>, i32 -> vector<8x64xf32>
      %cst_139 = arith.constant 0.000000e+00 : f32
      %285 = vector.broadcast %cst_139 : f32 to vector<8x64xf32>
      %286 = arith.select %45, %284, %285 : vector<8x64xi1>, vector<8x64xf32>
      %c0_140 = arith.constant 0 : index
      %c26 = arith.constant 26 : index
      %c0_141 = arith.constant 0 : index
      %287 = vector.load %arg5[%c0_140, %c26, %c0_141] : memref<1x36x64xf32, #tpu.memory_space<vmem>>, vector<1x1x64xf32>
      %288 = vector.shape_cast %287 : vector<1x1x64xf32> to vector<64xf32>
      %289 = vector.shape_cast %288 : vector<64xf32> to vector<1x64xf32>
      %290 = vector.broadcast %289 : vector<1x64xf32> to vector<8x64xf32>
      %291 = arith.mulf %290, %286 : vector<8x64xf32>
      %292 = arith.addf %283, %291 : vector<8x64xf32>
      %c0_142 = arith.constant 0 : index
      %c3_143 = arith.constant 3 : index
      %c0_144 = arith.constant 0 : index
      %c0_145 = arith.constant 0 : index
      %293 = vector.load %arg4[%c0_142, %c3_143, %c0_144, %c0_145] : memref<1x4x8x8xf32, #tpu.memory_space<vmem>>, vector<1x1x8x8xf32>
      %294 = vector.shape_cast %293 : vector<1x1x8x8xf32> to vector<8x8xf32>
      %295 = tpu.concatenate %294, %294, %294, %294, %294, %294, %294, %294 in 1 : vector<8x8xf32>, vector<8x8xf32>, vector<8x8xf32>, vector<8x8xf32>, vector<8x8xf32>, vector<8x8xf32>, vector<8x8xf32>, vector<8x8xf32> -> vector<8x64xf32>
      %c1_i32_146 = arith.constant 1 : i32
      %296 = tpu.dynamic_rotate %295 by %c1_i32_146 dim 0 : vector<8x64xf32>, i32 -> vector<8x64xf32>
      %c1_i32_147 = arith.constant 1 : i32
      %297 = tpu.dynamic_rotate %296 by %c1_i32_147 dim 1 : vector<8x64xf32>, i32 -> vector<8x64xf32>
      %cst_148 = arith.constant 0.000000e+00 : f32
      %298 = vector.broadcast %cst_148 : f32 to vector<8x64xf32>
      %299 = arith.select %22, %297, %298 : vector<8x64xi1>, vector<8x64xf32>
      %c0_149 = arith.constant 0 : index
      %c27 = arith.constant 27 : index
      %c0_150 = arith.constant 0 : index
      %300 = vector.load %arg5[%c0_149, %c27, %c0_150] : memref<1x36x64xf32, #tpu.memory_space<vmem>>, vector<1x1x64xf32>
      %301 = vector.shape_cast %300 : vector<1x1x64xf32> to vector<64xf32>
      %302 = vector.shape_cast %301 : vector<64xf32> to vector<1x64xf32>
      %303 = vector.broadcast %302 : vector<1x64xf32> to vector<8x64xf32>
      %304 = arith.mulf %303, %299 : vector<8x64xf32>
      %305 = arith.addf %292, %304 : vector<8x64xf32>
      %cst_151 = arith.constant 0.000000e+00 : f32
      %306 = vector.broadcast %cst_151 : f32 to vector<8x64xf32>
      %307 = arith.select %24, %296, %306 : vector<8x64xi1>, vector<8x64xf32>
      %c0_152 = arith.constant 0 : index
      %c28 = arith.constant 28 : index
      %c0_153 = arith.constant 0 : index
      %308 = vector.load %arg5[%c0_152, %c28, %c0_153] : memref<1x36x64xf32, #tpu.memory_space<vmem>>, vector<1x1x64xf32>
      %309 = vector.shape_cast %308 : vector<1x1x64xf32> to vector<64xf32>
      %310 = vector.shape_cast %309 : vector<64xf32> to vector<1x64xf32>
      %311 = vector.broadcast %310 : vector<1x64xf32> to vector<8x64xf32>
      %312 = arith.mulf %311, %307 : vector<8x64xf32>
      %313 = arith.addf %305, %312 : vector<8x64xf32>
      %c63_i32_154 = arith.constant 63 : i32
      %314 = tpu.dynamic_rotate %296 by %c63_i32_154 dim 1 : vector<8x64xf32>, i32 -> vector<8x64xf32>
      %cst_155 = arith.constant 0.000000e+00 : f32
      %315 = vector.broadcast %cst_155 : f32 to vector<8x64xf32>
      %316 = arith.select %29, %314, %315 : vector<8x64xi1>, vector<8x64xf32>
      %c0_156 = arith.constant 0 : index
      %c29 = arith.constant 29 : index
      %c0_157 = arith.constant 0 : index
      %317 = vector.load %arg5[%c0_156, %c29, %c0_157] : memref<1x36x64xf32, #tpu.memory_space<vmem>>, vector<1x1x64xf32>
      %318 = vector.shape_cast %317 : vector<1x1x64xf32> to vector<64xf32>
      %319 = vector.shape_cast %318 : vector<64xf32> to vector<1x64xf32>
      %320 = vector.broadcast %319 : vector<1x64xf32> to vector<8x64xf32>
      %321 = arith.mulf %320, %316 : vector<8x64xf32>
      %322 = arith.addf %313, %321 : vector<8x64xf32>
      %c1_i32_158 = arith.constant 1 : i32
      %323 = tpu.dynamic_rotate %295 by %c1_i32_158 dim 1 : vector<8x64xf32>, i32 -> vector<8x64xf32>
      %cst_159 = arith.constant 0.000000e+00 : f32
      %324 = vector.broadcast %cst_159 : f32 to vector<8x64xf32>
      %325 = arith.select %31, %323, %324 : vector<8x64xi1>, vector<8x64xf32>
      %c0_160 = arith.constant 0 : index
      %c30 = arith.constant 30 : index
      %c0_161 = arith.constant 0 : index
      %326 = vector.load %arg5[%c0_160, %c30, %c0_161] : memref<1x36x64xf32, #tpu.memory_space<vmem>>, vector<1x1x64xf32>
      %327 = vector.shape_cast %326 : vector<1x1x64xf32> to vector<64xf32>
      %328 = vector.shape_cast %327 : vector<64xf32> to vector<1x64xf32>
      %329 = vector.broadcast %328 : vector<1x64xf32> to vector<8x64xf32>
      %330 = arith.mulf %329, %325 : vector<8x64xf32>
      %331 = arith.addf %322, %330 : vector<8x64xf32>
      %c0_162 = arith.constant 0 : index
      %c31 = arith.constant 31 : index
      %c0_163 = arith.constant 0 : index
      %332 = vector.load %arg5[%c0_162, %c31, %c0_163] : memref<1x36x64xf32, #tpu.memory_space<vmem>>, vector<1x1x64xf32>
      %333 = vector.shape_cast %332 : vector<1x1x64xf32> to vector<64xf32>
      %334 = vector.shape_cast %333 : vector<64xf32> to vector<1x64xf32>
      %335 = vector.broadcast %334 : vector<1x64xf32> to vector<8x64xf32>
      %336 = arith.mulf %335, %295 : vector<8x64xf32>
      %337 = arith.addf %331, %336 : vector<8x64xf32>
      %c63_i32_164 = arith.constant 63 : i32
      %338 = tpu.dynamic_rotate %295 by %c63_i32_164 dim 1 : vector<8x64xf32>, i32 -> vector<8x64xf32>
      %cst_165 = arith.constant 0.000000e+00 : f32
      %339 = vector.broadcast %cst_165 : f32 to vector<8x64xf32>
      %340 = arith.select %33, %338, %339 : vector<8x64xi1>, vector<8x64xf32>
      %c0_166 = arith.constant 0 : index
      %c32 = arith.constant 32 : index
      %c0_167 = arith.constant 0 : index
      %341 = vector.load %arg5[%c0_166, %c32, %c0_167] : memref<1x36x64xf32, #tpu.memory_space<vmem>>, vector<1x1x64xf32>
      %342 = vector.shape_cast %341 : vector<1x1x64xf32> to vector<64xf32>
      %343 = vector.shape_cast %342 : vector<64xf32> to vector<1x64xf32>
      %344 = vector.broadcast %343 : vector<1x64xf32> to vector<8x64xf32>
      %345 = arith.mulf %344, %340 : vector<8x64xf32>
      %346 = arith.addf %337, %345 : vector<8x64xf32>
      %c7_i32_168 = arith.constant 7 : i32
      %347 = tpu.dynamic_rotate %295 by %c7_i32_168 dim 0 : vector<8x64xf32>, i32 -> vector<8x64xf32>
      %c1_i32_169 = arith.constant 1 : i32
      %348 = tpu.dynamic_rotate %347 by %c1_i32_169 dim 1 : vector<8x64xf32>, i32 -> vector<8x64xf32>
      %cst_170 = arith.constant 0.000000e+00 : f32
      %349 = vector.broadcast %cst_170 : f32 to vector<8x64xf32>
      %350 = arith.select %38, %348, %349 : vector<8x64xi1>, vector<8x64xf32>
      %c0_171 = arith.constant 0 : index
      %c33 = arith.constant 33 : index
      %c0_172 = arith.constant 0 : index
      %351 = vector.load %arg5[%c0_171, %c33, %c0_172] : memref<1x36x64xf32, #tpu.memory_space<vmem>>, vector<1x1x64xf32>
      %352 = vector.shape_cast %351 : vector<1x1x64xf32> to vector<64xf32>
      %353 = vector.shape_cast %352 : vector<64xf32> to vector<1x64xf32>
      %354 = vector.broadcast %353 : vector<1x64xf32> to vector<8x64xf32>
      %355 = arith.mulf %354, %350 : vector<8x64xf32>
      %356 = arith.addf %346, %355 : vector<8x64xf32>
      %cst_173 = arith.constant 0.000000e+00 : f32
      %357 = vector.broadcast %cst_173 : f32 to vector<8x64xf32>
      %358 = arith.select %40, %347, %357 : vector<8x64xi1>, vector<8x64xf32>
      %c0_174 = arith.constant 0 : index
      %c34 = arith.constant 34 : index
      %c0_175 = arith.constant 0 : index
      %359 = vector.load %arg5[%c0_174, %c34, %c0_175] : memref<1x36x64xf32, #tpu.memory_space<vmem>>, vector<1x1x64xf32>
      %360 = vector.shape_cast %359 : vector<1x1x64xf32> to vector<64xf32>
      %361 = vector.shape_cast %360 : vector<64xf32> to vector<1x64xf32>
      %362 = vector.broadcast %361 : vector<1x64xf32> to vector<8x64xf32>
      %363 = arith.mulf %362, %358 : vector<8x64xf32>
      %364 = arith.addf %356, %363 : vector<8x64xf32>
      %c63_i32_176 = arith.constant 63 : i32
      %365 = tpu.dynamic_rotate %347 by %c63_i32_176 dim 1 : vector<8x64xf32>, i32 -> vector<8x64xf32>
      %cst_177 = arith.constant 0.000000e+00 : f32
      %366 = vector.broadcast %cst_177 : f32 to vector<8x64xf32>
      %367 = arith.select %45, %365, %366 : vector<8x64xi1>, vector<8x64xf32>
      %c0_178 = arith.constant 0 : index
      %c35 = arith.constant 35 : index
      %c0_179 = arith.constant 0 : index
      %368 = vector.load %arg5[%c0_178, %c35, %c0_179] : memref<1x36x64xf32, #tpu.memory_space<vmem>>, vector<1x1x64xf32>
      %369 = vector.shape_cast %368 : vector<1x1x64xf32> to vector<64xf32>
      %370 = vector.shape_cast %369 : vector<64xf32> to vector<1x64xf32>
      %371 = vector.broadcast %370 : vector<1x64xf32> to vector<8x64xf32>
      %372 = arith.mulf %371, %367 : vector<8x64xf32>
      %373 = arith.addf %364, %372 : vector<8x64xf32>
      %c0_180 = arith.constant 0 : index
      %c0_181 = arith.constant 0 : index
      %374 = vector.load %arg10[%c0_180, %c0_181] : memref<8x64xf32, #tpu.memory_space<vmem>>, vector<8x64xf32>
      tpu.vector_store %arg10[%c0_180, %c0_181], %373 {strides = array<i32>} : memref<8x64xf32, #tpu.memory_space<vmem>>, vector<8x64xf32>,
    } else {
    }
    %c0 = arith.constant 0 : index
    %c0_1 = arith.constant 0 : index
    %3 = vector.load %arg7[%c0, %c0_1] : memref<16x8xf32, #tpu.memory_space<vmem>>, vector<16x8xf32>
    %c0_2 = arith.constant 0 : index
    %c0_3 = arith.constant 0 : index
    %4 = vector.load %arg10[%c0_2, %c0_3] : memref<8x64xf32, #tpu.memory_space<vmem>>, vector<8x64xf32>
    %cst = arith.constant dense<0.000000e+00> : vector<16x64xf32>
    %5 = tpu.matmul %3, %4, %cst {dimension_numbers = #tpu.dot_dimension_numbers<[1], [0], [0], [1], [0, 0, 1, 1], [], []>} : vector<16x8xf32>, vector<8x64xf32>, vector<16x64xf32> -> vector<16x64xf32>
    %c0_4 = arith.constant 0 : index
    %c0_5 = arith.constant 0 : index
    %6 = vector.load %arg8[%c0_4, %c0_5] : memref<64x128xf32, #tpu.memory_space<vmem>>, vector<64x128xf32>
    %cst_6 = arith.constant dense<0.000000e+00> : vector<16x128xf32>
    %7 = tpu.matmul %5, %6, %cst_6 {dimension_numbers = #tpu.dot_dimension_numbers<[1], [0], [0], [1], [0, 0, 1, 1], [], []>} : vector<16x64xf32>, vector<64x128xf32>, vector<16x128xf32> -> vector<16x128xf32>
    %c0_7 = arith.constant 0 : index
    %c0_8 = arith.constant 0 : index
    %c0_9 = arith.constant 0 : index
    %c0_10 = arith.constant 0 : index
    %8 = vector.load %arg3[%c0_7, %c0_8, %c0_9, %c0_10] : memref<1x1x16x128xf32, #tpu.memory_space<vmem>>, vector<1x1x16x128xf32>
    %9 = vector.shape_cast %8 : vector<1x1x16x128xf32> to vector<16x128xf32>
    %10 = arith.mulf %9, %7 : vector<16x128xf32>
    %c0_11 = arith.constant 0 : index
    %c0_12 = arith.constant 0 : index
    %c0_13 = arith.constant 0 : index
    %c0_14 = arith.constant 0 : index
    %11 = vector.load %arg9[%c0_11, %c0_12, %c0_13, %c0_14] : memref<1x1x16x128xf32, #tpu.memory_space<vmem>>, vector<1x1x16x128xf32>
    %12 = vector.shape_cast %11 : vector<1x1x16x128xf32> to vector<16x128xf32>
    %13 = vector.shape_cast %10 : vector<16x128xf32> to vector<1x1x16x128xf32>
    tpu.vector_store %arg9[%c0_11, %c0_12, %c0_13, %c0_14], %13 {strides = array<i32>} : memref<1x1x16x128xf32, #tpu.memory_space<vmem>>, vector<1x1x16x128xf32>,
    return
  }
  func.func @transform_0(%arg0: i32, %arg1: i32, %arg2: i32) -> (i32, i32, i32, i32) {
    %c0_i32 = arith.constant 0 : i32
    %c0_i32_0 = arith.constant 0 : i32
    return %arg0, %arg1, %arg2, %c0_i32 : i32, i32, i32, i32
  }
  func.func @transform_1(%arg0: i32, %arg1: i32, %arg2: i32) -> (i32, i32, i32, i32) {
    %c0_i32 = arith.constant 0 : i32
    %c0_i32_0 = arith.constant 0 : i32
    %c0_i32_1 = arith.constant 0 : i32
    %c0_i32_2 = arith.constant 0 : i32
    return %arg0, %c0_i32, %c0_i32_0, %c0_i32_1 : i32, i32, i32, i32
  }
  func.func @transform_2(%arg0: i32, %arg1: i32, %arg2: i32) -> (i32, i32, i32) {
    %c0_i32 = arith.constant 0 : i32
    %c0_i32_0 = arith.constant 0 : i32
    %c0_i32_1 = arith.constant 0 : i32
    return %arg1, %c0_i32, %c0_i32_0 : i32, i32, i32
  }
  func.func @transform_3(%arg0: i32, %arg1: i32, %arg2: i32) -> (i32, i32, i32) {
    %c0_i32 = arith.constant 0 : i32
    %c0_i32_0 = arith.constant 0 : i32
    %c0_i32_1 = arith.constant 0 : i32
    return %arg1, %c0_i32, %c0_i32_0 : i32, i32, i32
  }
  func.func @transform_4(%arg0: i32, %arg1: i32, %arg2: i32) -> (i32, i32) {
    %c0_i32 = arith.constant 0 : i32
    %c0_i32_0 = arith.constant 0 : i32
    return %arg2, %c0_i32 : i32, i32
  }
  func.func @transform_5(%arg0: i32, %arg1: i32, %arg2: i32) -> (i32, i32) {
    %c0_i32 = arith.constant 0 : i32
    %c0_i32_0 = arith.constant 0 : i32
    %c0_i32_1 = arith.constant 0 : i32
    return %c0_i32, %c0_i32_0 : i32, i32
  }
  func.func @transform_6(%arg0: i32, %arg1: i32, %arg2: i32) -> (i32, i32, i32, i32) {
    %c0_i32 = arith.constant 0 : i32
    %c0_i32_0 = arith.constant 0 : i32
    return %arg0, %arg1, %arg2, %c0_i32 : i32, i32, i32, i32
  }
}

</mosaic_0001>

<bundles_post_ra>
// kernel: tpu_custom_call.1
= control target key start
LH: loop header
LB: loop body
LE: loop exit
PB: predicated region body
PF: predicated region fallthrough
CT: control target
= control target key end

     0   :  { %11 = vsyncpa [#allocation4], 0  ;;  %s2325_s0 = inlined_call_operand.vmem [shape: f32[2,1,16,128], index: 0, kind: input, shape index: {}]   ;;  %s2326_s1 = inlined_call_operand.vmem [shape: f32[2,4,8,8], index: 1, kind: input, shape index: {}]   ;;  %s2327_s2 = inlined_call_operand.vmem [shape: f32[1,36,64], index: 2, kind: input, shape index: {}]   ;;  %s2328_s3 = inlined_call_operand.vmem [shape: f32[1,1,64], index: 3, kind: input, shape index: {}]   ;;  %s2329_s4 = inlined_call_operand.vmem [shape: f32[16,8], index: 4, kind: input, shape index: {}]   ;;  %s2330_s5 = inlined_call_operand.hbm [shape: f32[64,128], index: 5, kind: input, shape index: {}]   ;;  %s2331_s6 = inlined_call_operand.hbm [shape: f32[2,1,16,128], index: 6, kind: output, shape index: {}]  }
   0x1   :  { %12 = vsyncpa [#allocation5], 0 }
   0x2   :  { %14 = vsyncpa [#allocation5 + $0x1], 0  ;;  %s1716_s21 = smov 0   ;;  %s1718_s22 = smov 0  }
   0x3   :  { %s1720_s23 = smov 0   ;;  %s1722_s24 = smov 0  }
   0x4   :  { %s1724_s25 = smov 0   ;;  %s1726_s26 = smov 0  }
   0x5 LB: > { %s1375_s27 = sadd.s32 4294967295, %s1664_s26   ;;  %s1376_s28 = sadd.s32 4294967294, %s1664_s26   ;;  %s1664_s26 = sphi %s1726_s26, %s20_s26   ;;  %s1660_s25 = sphi %s1724_s25, %s2348_s25   ;;  %s1656_s24 = sphi %s1722_s24, %s2347_s24   ;;  %s1652_s23 = sphi %s1720_s23, %s2346_s23   ;;  %s1648_s22 = sphi %s1718_s22, %s2345_s22   ;;  %s1644_s21 = sphi %s1716_s21, %s2344_s21  }
   0x6   : > { %s39_s29 = sadd.s32 1, %s1660_s25  ;;  %s205_s30 = sadd.s32 1, %s1652_s23 }
   0x7   : > { %p41_p0 = scmp.ge.s32.totalorder %s39_s29, 2  ;;  %p215_p1 = scmp.ne.s32.totalorder %s1652_s23, %s1648_s22 }
   0x8   : > { %p216_p2 = scmp.eq.s32.totalorder %s1375_s27, 1  ;;  %p221_p3 = scmp.ne.s32.totalorder %s1648_s22, %s1644_s21 }
   0x9   : > { %s2350_s29 = smov (%p41_p0, %s39_s29), 0  ;;  %p222_p5 = scmp.eq.s32.totalorder %s1376_s28, 1 }
   0xa   : > { %p1756_p4 = por %p216_p2, %p215_p1  ;;  %s198_s8 = ssub.s32 %s1660_s25, %s2350_s29 }
   0xb   : > { %p1377_p6 = scmp.ge.s32.totalorder %s1664_s26, 1  ;;  %p203_p7 = scmp.eq.s32.totalorder %s198_s8, 0 }
   0xc   : > { %p1763_p8 = por %p222_p5, %p221_p3  ;;  %p229_p9 = scmp.lt.s32.totalorder %s1664_s26, 3 }
   0xd   : > { %s1769_s10 = scalar_select %p203_p7, %s1652_s23, %s205_s30  }
   0xe   : > { %p1771_p10 = pnand %p1377_p6, %p229_p9  ;;  %p1775_p11 = scmp.eq.s32.totalorder %s1375_s27, 0 }
   0xf   : > { %s1666_s13 = smov [#allocation3]  }
  0x10   : > { %p1485_p12 = pneg %p1771_p10  ;;  %s264_s14 = sshll.u32 %s1666_s13, 4  ;;  %s265_s14 = int_to_ptr.vmem [resolvable:$true] %s264_s14 }
  0x11   : > { %s1569_s15 = scalar_lea.vmem %s265_s14, 1024  ;;  %p1577_p5 = scmp.lt.s32.totalorder %s265_s14, %s265_s14 }
  0x12   : > { %p1486_p13 = pnand %p1775_p11, %p1485_p12  ;;  %p1570_p1 = scmp.ne.s32.totalorder %s265_s14, %s1569_s15 }
  0x13   : > { %p1578_p6 = scmp.lt.s32.totalorder %s1569_s15, %s1569_s15 }
  0x14   : > { %p1560_p0 = pneg %p1486_p13 }
  0x15   : > { %p1579_p7 = por %p1578_p6, %p1577_p5 }
  0x16   : > { %p1572_p2 = pnand %p1570_p1, %p1560_p0 }
  0x18   : > { %p1573_p3 = pneg %p1572_p2 }
  0x1a   : > { %p1580_p9 = pnand %p1579_p7, %p1573_p3 }
  0x1c   : > { %1583 = shalt.err (!%p1580_p9)
}
  0x1d   : > { %s1667_s16 = smov 128   ;;  %s1668_s17 = smov 8  }
  0x1e   : > { %1488 = dma.hbm_to_vmem [thread:$0]  (!%p1486_p13), %s2330_s5, 1024, %s265_s14, [#allocation4], %s1667_s16, %s1667_s16, %s1668_s17  }
  0x1f   : > { %305 = sbr.rel (%p1771_p10) target bundleno = 1071 (0x42f), region = 44 }
  0x24   : > { %1635 = dma.done.wait (%p1775_p11), [#allocation4], 1024  }
  0x25   : > { %1637 = vsyncadd (%p1775_p11), [#allocation4], 4294966272  ;;  %p362_p12 = scmp.lt.s32.totalorder %s1656_s24, 1  ;;  %s1669_s11 = smov 8   ;;  %vm417_vm0 = vcmask 64512   ;;  %vm419_vm1 = vcmask 130048  }
  0x26   : > { %s1670_s12 = smov 24   ;;  %s1671_s13 = smov 16   ;;  %vm421_vm2 = vcmask 195584   ;;  %vm423_vm3 = vcmask 261120   ;;  %vm425_vm4 = vcmask 326656   ;;  %vm427_vm5 = vcmask 392192  }
  0x27   : > { %s1794_s20 = scalar_select %p362_p12, %s1656_s24, 1  ;;  %vm429_vm6 = vcmask 457728   ;;  %vm477_vm7 = vcmask 1048064  }
  0x28   : > { %s1672_s14 = smov 32   ;;  %s1673_s15 = smov 40  }
  0x29   : > { %s1440_s27 = sshll.u32 %s1794_s20, 5  ;;  %s1674_s16 = smov 48  }
  0x2a   : > { %s1800_s8 = scalar_lea.vmem %s2326_s1, %s1440_s27  ;;  %s1675_s17 = smov 56  }
  0x2b   : > { %v446_v0 = vld [vmem:[%s1800_s8] sm:$0xff]  ;;  %v1400_v1 = vld [vmem:[%s1800_s8 + $0x8] sm:$0xff]  ;;  %v1410_v2 = vld [vmem:[%s1800_s8 + $0x10] sm:$0xff]  ;;  %s1676_s18 = smov 64   ;;  %s1677_s19 = smov 65  }
  0x2c   : > { %448 = vrot.lane.b32.xlu0 %v446_v0, %s1669_s11  ;;  %454 = vrot.lane.b32.xlu1 %v446_v0, %s1670_s12  ;;  %v1826_v3 = vld [vmem:[%s1800_s8 + $0x18] sm:$0xff]  ;;  %s1678_s27 = smov 127  }
  0x30   : > { %451 = vrot.lane.b32.xlu0 %v446_v0, %s1671_s13  ;;  %457 = vrot.lane.b32.xlu1 %v446_v0, %s1672_s14 }
  0x34   : > { %460 = vrot.lane.b32.xlu0 %v446_v0, %s1673_s15  ;;  %463 = vrot.lane.b32.xlu1 %v446_v0, %s1674_s16 }
  0x38   : > { %466 = vrot.lane.b32.xlu0 %v446_v0, %s1675_s17  ;;  %592 = vrot.lane.b32.xlu1 %v1400_v1, %s1669_s11 }
  0x3c   : > { %595 = vrot.lane.b32.xlu0 %v1400_v1, %s1671_s13  ;;  %598 = vrot.lane.b32.xlu1 %v1400_v1, %s1670_s12 }
  0x40   : > { %601 = vrot.lane.b32.xlu0 %v1400_v1, %s1672_s14  ;;  %604 = vrot.lane.b32.xlu1 %v1400_v1, %s1673_s15 }
  0x44   : > { %607 = vrot.lane.b32.xlu0 %v1400_v1, %s1674_s16  ;;  %610 = vrot.lane.b32.xlu1 %v1400_v1, %s1675_s17 }
  0x48   : > { %735 = vrot.lane.b32.xlu0 %v1410_v2, %s1669_s11  ;;  %738 = vrot.lane.b32.xlu1 %v1410_v2, %s1671_s13 }
  0x4c   : > { %741 = vrot.lane.b32.xlu0 %v1410_v2, %s1670_s12  ;;  %744 = vrot.lane.b32.xlu1 %v1410_v2, %s1672_s14 }
  0x50   : > { %747 = vrot.lane.b32.xlu0 %v1410_v2, %s1673_s15  ;;  %750 = vrot.lane.b32.xlu1 %v1410_v2, %s1674_s16 }
  0x54   : > { %753 = vrot.lane.b32.xlu0 %v1410_v2, %s1675_s17  ;;  %878 = vrot.lane.b32.xlu1 %v1826_v3, %s1669_s11 }
  0x58   : > { %881 = vrot.lane.b32.xlu0 %v1826_v3, %s1671_s13  ;;  %884 = vrot.lane.b32.xlu1 %v1826_v3, %s1670_s12 }
  0x5c   : > { %887 = vrot.lane.b32.xlu0 %v1826_v3, %s1672_s14  ;;  %890 = vrot.lane.b32.xlu1 %v1826_v3, %s1673_s15 }
  0x60   : > { %893 = vrot.lane.b32.xlu0 %v1826_v3, %s1674_s16  ;;  %896 = vrot.lane.b32.xlu1 %v1826_v3, %s1675_s17 }
  0x9e   : > { %v449_v4 = vpop.permute.xlu0 %448  ;;  %v455_v5 = vpop.permute.xlu1 %454 }
  0x9f   : > { %v469_v6 = vsel %vm417_vm0, %v446_v0, %v449_v4 }
  0xa2   : > { %v452_v7 = vpop.permute.xlu0 %451  ;;  %v458_v8 = vpop.permute.xlu1 %457 }
  0xa3   : > { %v470_v9 = vsel %vm419_vm1, %v469_v6, %v452_v7 }
  0xa4   : > { %v471_v10 = vsel %vm421_vm2, %v470_v9, %v455_v5 }
  0xa5   : > { %v472_v11 = vsel %vm423_vm3, %v471_v10, %v458_v8 }
  0xa6   : > { %v461_v12 = vpop.permute.xlu0 %460  ;;  %v464_v13 = vpop.permute.xlu1 %463 }
  0xa7   : > { %v473_v14 = vsel %vm425_vm4, %v472_v11, %v461_v12 }
  0xa8   : > { %v474_v15 = vsel %vm427_vm5, %v473_v14, %v464_v13 }
  0xaa   : > { %v467_v16 = vpop.permute.xlu0 %466  ;;  %v593_v17 = vpop.permute.xlu1 %592 }
  0xab   : > { %v1850_v18 = vsel %vm429_vm6, %v474_v15, %v467_v16  ;;  %v613_v19 = vsel %vm417_vm0, %v1400_v1, %v593_v17 }
  0xac   : > { %515 = vrot.lane.b32.xlu1 %v1850_v18, %s1676_s18  ;;  %v1856_v20 = vrot.slane %v1850_v18, 7  ;;  %v1863_v25 = vrot.slane %v1850_v18, 1 }
  0xae   : > { %478 = vrot.lane.b32.xlu0 %v1856_v20, %s1676_s18  ;;  %v596_v21 = vpop.permute.xlu0 %595  ;;  %v599_v22 = vpop.permute.xlu1 %598 }
  0xaf   : > { %v614_v23 = vsel %vm419_vm1, %v613_v19, %v596_v21  ;;  %v399_v21 = vlaneseq }
  0xb0   : > { %v615_v24 = vsel %vm421_vm2, %v614_v23, %v599_v22 }
  0xb1   : > { %v402_v23 = vand.u32 127, %v399_v21 }
  0xb2   : > { %552 = vrot.lane.b32.xlu0 %v1863_v25, %s1676_s18  ;;  %v602_v26 = vpop.permute.xlu0 %601  ;;  %v605_v27 = vpop.permute.xlu1 %604 }
  0xb3   : > { %v616_v28 = vsel %vm423_vm3, %v615_v24, %v602_v26 }
  0xb4   : > { %v617_v29 = vsel %vm425_vm4, %v616_v28, %v605_v27 }
  0xb6   : > { %v608_v30 = vpop.permute.xlu0 %607  ;;  %v611_v31 = vpop.permute.xlu1 %610 }
  0xb7   : > { %v618_v32 = vsel %vm427_vm5, %v617_v29, %v608_v30 }
  0xb8   : > { %v1871_v33 = vsel %vm429_vm6, %v618_v32, %v611_v31 }
  0xb9   : > { %658 = vrot.lane.b32.xlu0 %v1871_v33, %s1676_s18  ;;  %v1876_v34 = vrot.slane %v1871_v33, 7  ;;  %v1882_v38 = vrot.slane %v1871_v33, 1 }
  0xba   : > { %v736_v35 = vpop.permute.xlu0 %735  ;;  %v739_v36 = vpop.permute.xlu1 %738 }
  0xbb   : > { %v756_v37 = vsel %vm417_vm0, %v1410_v2, %v736_v35  ;;  %621 = vrot.lane.b32.xlu1 %v1876_v34, %s1676_s18 }
  0xbc   : > { %v757_v39 = vsel %vm419_vm1, %v756_v37, %v739_v36 }
  0xbe   : > { %v742_v40 = vpop.permute.xlu0 %741  ;;  %v745_v41 = vpop.permute.xlu1 %744 }
  0xbf   : > { %v758_v42 = vsel %vm421_vm2, %v757_v39, %v742_v40  ;;  %695 = vrot.lane.b32.xlu1 %v1882_v38, %s1676_s18 }
  0xc0   : > { %v759_v43 = vsel %vm423_vm3, %v758_v42, %v745_v41 }
  0xc2   : > { %v748_v44 = vpop.permute.xlu0 %747  ;;  %v751_v45 = vpop.permute.xlu1 %750 }
  0xc3   : > { %v760_v46 = vsel %vm425_vm4, %v759_v43, %v748_v44 }
  0xc4   : > { %v761_v47 = vsel %vm427_vm5, %v760_v46, %v751_v45 }
  0xc6   : > { %v754_v48 = vpop.permute.xlu0 %753  ;;  %v879_v49 = vpop.permute.xlu1 %878 }
  0xc7   : > { %v1892_v50 = vsel %vm429_vm6, %v761_v47, %v754_v48  ;;  %v899_v51 = vsel %vm417_vm0, %v1826_v3, %v879_v49 }
  0xc8   : > { %801 = vrot.lane.b32.xlu1 %v1892_v50, %s1676_s18  ;;  %v1899_v52 = vrot.slane %v1892_v50, 7  ;;  %v1904_v55 = vrot.slane %v1892_v50, 1 }
  0xca   : > { %764 = vrot.lane.b32.xlu0 %v1899_v52, %s1676_s18  ;;  %v882_v53 = vpop.permute.xlu0 %881  ;;  %v885_v54 = vpop.permute.xlu1 %884 }
  0xcb   : > { %v900_v56 = vsel %vm419_vm1, %v899_v51, %v882_v53 }
  0xcc   : > { %v901_v57 = vsel %vm421_vm2, %v900_v56, %v885_v54 }
  0xce   : > { %838 = vrot.lane.b32.xlu0 %v1904_v55, %s1676_s18  ;;  %v888_v58 = vpop.permute.xlu0 %887  ;;  %v891_v59 = vpop.permute.xlu1 %890 }
  0xcf   : > { %v902_v60 = vsel %vm423_vm3, %v901_v57, %v888_v58 }
  0xd0   : > { %v903_v61 = vsel %vm425_vm4, %v902_v60, %v891_v59 }
  0xd2   : > { %v894_v62 = vpop.permute.xlu0 %893  ;;  %v897_v63 = vpop.permute.xlu1 %896 }
  0xd3   : > { %v904_v0 = vsel %vm427_vm5, %v903_v61, %v894_v62 }
  0xd4   : > { %v1914_v1 = vsel %vm429_vm6, %v904_v0, %v897_v63 }
  0xd5   : > { %v1917_v2 = vrot.slane %v1914_v1, 7  ;;  %v1924_v3 = vrot.slane %v1914_v1, 1 }
  0xd7   : > { %907 = vrot.lane.b32.xlu1 %v1917_v2, %s1676_s18 }
  0xdb   : > { %944 = vrot.lane.b32.xlu1 %v1914_v1, %s1676_s18 }
  0xdf   : > { %981 = vrot.lane.b32.xlu1 %v1924_v3, %s1676_s18 }
 0x11e   : > { %v516_v6 = vpop.permute.xlu1 %515 }
 0x11f   : > { %v517_v7 = vsel %vm477_vm7, %v516_v6, %v1850_v18 }
 0x120   : > { %v479_v4 = vpop.permute.xlu0 %478 }
 0x121   : > { %v480_v5 = vsel %vm477_vm7, %v479_v4, %v1856_v20 }
 0x122   : > { %481 = vrot.lane.b32.xlu0 %v480_v5, %s1676_s18 }
 0x124   : > { %v553_v8 = vpop.permute.xlu0 %552 }
 0x125   : > { %v554_v9 = vsel %vm477_vm7, %v553_v8, %v1863_v25 }
 0x126   : > { %518 = vrot.lane.b32.xlu0 %v517_v7, %s1676_s18 }
 0x12a   : > { %555 = vrot.lane.b32.xlu0 %v554_v9, %s1676_s18 }
 0x12b   : > { %v659_v10 = vpop.permute.xlu0 %658 }
 0x12c   : > { %v660_v11 = vsel %vm477_vm7, %v659_v10, %v1871_v33 }
 0x12d   : > { %v622_v12 = vpop.permute.xlu1 %621 }
 0x12e   : > { %661 = vrot.lane.b32.xlu0 %v660_v11, %s1676_s18  ;;  %v623_v13 = vsel %vm477_vm7, %v622_v12, %v1876_v34 }
 0x12f   : > { %624 = vrot.lane.b32.xlu1 %v623_v13, %s1676_s18 }
 0x131   : > { %v696_v14 = vpop.permute.xlu1 %695 }
 0x132   : > { %v697_v15 = vsel %vm477_vm7, %v696_v14, %v1882_v38  ;;  %v2026_v14 = vshrl.u32 %v399_v21, 7  ;;  %v1390_v21 = vld [vmem:[%s2328_s3] ss:$0 sm:$0xff] }
 0x133   : > { %698 = vrot.lane.b32.xlu1 %v697_v15, %s1676_s18  ;;  %v1391_v15 = vld [vmem:[%s2327_s2] ss:$0 sm:$0xff] }
 0x134   : > { %vm431_vm9 = vcmp.ge.s32.totalorder %v2026_v14, 1  ;;  %vm436_vm13 = vcmp.lt.s32.totalorder %v2026_v14, 7 }
 0x13a   : > { %v802_v16 = vpop.permute.xlu1 %801 }
 0x13b   : > { %v803_v17 = vsel %vm477_vm7, %v802_v16, %v1892_v50 }
 0x13c   : > { %804 = vrot.lane.b32.xlu1 %v803_v17, %s1676_s18  ;;  %v765_v19 = vpop.permute.xlu0 %764 }
 0x13d   : > { %v766_v22 = vsel %vm477_vm7, %v765_v19, %v1899_v52  ;;  %v1392_v19 = vld [vmem:[%s2327_s2 + $0x1] ss:$0 sm:$0xff] }
 0x13e   : > { %767 = vrot.lane.b32.xlu0 %v766_v22, %s1676_s18 }
 0x140   : > { %403 = vrot.lane.b32.xlu1 %v402_v23, %s1669_s11  ;;  %v839_v24 = vpop.permute.xlu0 %838 }
 0x141   : > { %v840_v26 = vsel %vm477_vm7, %v839_v24, %v1904_v55 }
 0x142   : > { %405 = vrot.lane.b32.xlu0 %v402_v23, %s1671_s13 }
 0x144   : > { %407 = vrot.lane.b32.xlu1 %v402_v23, %s1670_s12 }
 0x146   : > { %409 = vrot.lane.b32.xlu0 %v402_v23, %s1672_s14 }
 0x148   : > { %411 = vrot.lane.b32.xlu1 %v402_v23, %s1673_s15  ;;  %s358_s15 = sand.u32 1, %s1648_s22  }
 0x149   : > { %v908_v27 = vpop.permute.xlu1 %907  ;;  %s2279_s14 = scalar_lea.sflag [#allocation5], %s358_s15 }
 0x14a   : > { %841 = vrot.lane.b32.xlu0 %v840_v26, %s1676_s18  ;;  %v909_v28 = vsel %vm477_vm7, %v908_v27, %v1917_v2  ;;  %v1393_v26 = vld [vmem:[%s2327_s2 + $0x2] ss:$0 sm:$0xff] }
 0x14c   : > { %413 = vrot.lane.b32.xlu1 %v402_v23, %s1674_s16  ;;  %s1439_s16 = sshll.u32 %s1794_s20, 4 }
 0x14d   : > { %v945_v29 = vpop.permute.xlu1 %944  ;;  %s373_s30 = scalar_lea.vmem %s2325_s0, %s1439_s16 }
 0x14e   : > { %910 = vrot.lane.b32.xlu0 %v909_v28, %s1676_s18  ;;  %v946_v30 = vsel %vm477_vm7, %v945_v29, %v1914_v1 }
 0x151   : > { %v982_v37 = vpop.permute.xlu1 %981 }
 0x152   : > { %415 = vrot.lane.b32.xlu0 %v402_v23, %s1675_s17  ;;  %v983_v39 = vsel %vm477_vm7, %v982_v37, %v1924_v3  ;;  %s1385_s17 = sshll.u32 %s358_s15, 4 }
 0x153   : > { %s360_s8 = scalar_lea.vmem [#allocation6], %s1385_s17 }
 0x154   : > { %s1219_s12 = sshll.u32 %s360_s8, 4  ;;  %s2272_s12 = int_to_ptr.vmem [resolvable:$true] %s1219_s12 }
 0x155   : > { %s1584_s16 = scalar_lea.vmem %s2272_s12, 256 }
 0x156   : > { %947 = vrot.lane.b32.xlu0 %v946_v30, %s1676_s18  ;;  %p1585_p10 = scmp.ne.s32.totalorder %s2272_s12, %s1584_s16 }
 0x158   : > { %p1586_p11 = pnand %p1585_p10, %p1756_p4 }
 0x15a   : > { %p1587_p13 = pneg %p1586_p11 }
 0x194   : > { %v482_v31 = vpop.permute.xlu0 %481 }
 0x195   : > { %v483_v32 = vsel %vm477_vm7, %v482_v31, %v1856_v20 }
 0x196   : > { %485 = vrot.lane.b32.xlu1 %v483_v32, %s1677_s19 }
 0x198   : > { %v519_v35 = vpop.permute.xlu0 %518 }
 0x199   : > { %v520_v36 = vsel %vm477_vm7, %v519_v35, %v1850_v18 }
 0x19a   : > { %504 = vrot.lane.b32.xlu1 %v483_v32, %s1678_s27  ;;  %522 = vrot.lane.b32.xlu0 %v520_v36, %s1677_s19  ;;  %v1394_v32 = vld [vmem:[%s2327_s2 + $0x3] ss:$0 sm:$0xff] }
 0x19c   : > { %v556_v40 = vpop.permute.xlu0 %555 }
 0x19d   : > { %v557_v41 = vsel %vm477_vm7, %v556_v40, %v1863_v25 }
 0x19e   : > { %984 = vrot.lane.b32.xlu1 %v983_v39, %s1676_s18  ;;  %540 = vrot.lane.b32.xlu0 %v520_v36, %s1678_s27 }
 0x1a0   : > { %v662_v44 = vpop.permute.xlu0 %661 }
 0x1a1   : > { %v625_v42 = vpop.permute.xlu1 %624  ;;  %v663_v45 = vsel %vm477_vm7, %v662_v44, %v1871_v33 }
 0x1a2   : > { %578 = vrot.lane.b32.xlu0 %v557_v41, %s1678_s27  ;;  %559 = vrot.lane.b32.xlu1 %v557_v41, %s1677_s19  ;;  %v626_v43 = vsel %vm477_vm7, %v625_v42, %v1876_v34  ;;  %v1395_v42 = vld [vmem:[%s2327_s2 + $0x4] ss:$0 sm:$0xff] }
 0x1a5   : > { %v699_v46 = vpop.permute.xlu1 %698 }
 0x1a6   : > { %647 = vrot.lane.b32.xlu0 %v626_v43, %s1678_s27  ;;  %628 = vrot.lane.b32.xlu1 %v626_v43, %s1677_s19  ;;  %v700_v47 = vsel %vm477_vm7, %v699_v46, %v1882_v38  ;;  %v538_v46 = vmul.f32 %v1395_v42, %v1850_v18  ;;  %v1020_v18 = vld [vmem:[%s2329_s4] sm:$0xff] }
 0x1a7   : > { %1457 = vmatprep.mubr.msk.f32.mxu0 %vm417_vm0, %v1020_v18 }
 0x1aa   : > { %683 = vrot.lane.b32.xlu0 %v663_v45, %s1678_s27  ;;  %665 = vrot.lane.b32.xlu1 %v663_v45, %s1677_s19 }
 0x1ae   : > { %v805_v48 = vpop.permute.xlu1 %804  ;;  %721 = vrot.lane.b32.xlu0 %v700_v47, %s1678_s27  ;;  %702 = vrot.lane.b32.xlu1 %v700_v47, %s1677_s19 }
 0x1af   : > { %v806_v57 = vsel %vm477_vm7, %v805_v48, %v1892_v50  ;;  %v1396_v48 = vld [vmem:[%s2327_s2 + $0x5] ss:$0 sm:$0xff] }
 0x1b0   : > { %v768_v49 = vpop.permute.xlu0 %767 }
 0x1b1   : > { %v769_v51 = vsel %vm477_vm7, %v768_v49, %v1899_v52 }
 0x1b2   : > { %790 = vrot.lane.b32.xlu0 %v769_v51, %s1678_s27  ;;  %771 = vrot.lane.b32.xlu1 %v769_v51, %s1677_s19  ;;  %v404_v53 = vpop.permute.xlu1 %403 }
 0x1b3   : > { %v418_v54 = vsel %vm417_vm0, %v402_v23, %v404_v53  ;;  %v496_v23 = vsel %vm431_vm9, %v1856_v20, 0.0 }
 0x1b4   : > { %v406_v56 = vpop.permute.xlu0 %405  ;;  %v502_v28 = vmul.f32 %v1392_v19, %v496_v23  ;;  %v1401_v19 = vld [vmem:[%s2327_s2 + $0x9] ss:$0 sm:$0xff] }
 0x1b5   : > { %v420_v58 = vsel %vm419_vm1, %v418_v54, %v406_v56  ;;  %v1397_v54 = vld [vmem:[%s2327_s2 + $0x6] ss:$0 sm:$0xff]  ;;  %vm1018_vm1 = vcmask 523264  }
 0x1b6   : > { %826 = vrot.lane.b32.xlu0 %v806_v57, %s1678_s27  ;;  %808 = vrot.lane.b32.xlu1 %v806_v57, %s1677_s19  ;;  %v408_v59 = vpop.permute.xlu1 %407 }
 0x1b7   : > { %v422_v60 = vsel %vm421_vm2, %v420_v58, %v408_v59  ;;  %v1112_v58 = vld [vmem:[#allocation3 + $0x38] sm:$0xff]  ;;  %v1111_v59 = vld [vmem:[#allocation3 + $0x30] sm:$0xff] }
 0x1b8   : > { %v410_v61 = vpop.permute.xlu0 %409  ;;  %1460 = vmatprep.subr.mxu1 %v1112_v58 }
 0x1b9   : > { %v424_v62 = vsel %vm423_vm3, %v422_v60, %v410_v61  ;;  %1461 = vmatpush3.msra.mxu1 %v1112_v58 }
 0x1ba   : > { %v412_v63 = vpop.permute.xlu1 %411  ;;  %1462 = vmatprep.subr.mxu1 %v1111_v59 }
 0x1bb   : > { %v426_v5 = vsel %vm425_vm4, %v424_v62, %v412_v63  ;;  %v1110_v62 = vld [vmem:[#allocation3 + $0x28] sm:$0xff]  ;;  %1463 = vmatpush3.msra.mxu1 %v1111_v59  ;;  %v1109_v63 = vld [vmem:[#allocation3 + $0x20] sm:$0xff] }
 0x1bc   : > { %v842_v0 = vpop.permute.xlu0 %841  ;;  %1464 = vmatprep.subr.mxu1 %v1110_v62 }
 0x1bd   : > { %v843_v4 = vsel %vm477_vm7, %v842_v0, %v1904_v55  ;;  %v570_v0 = vsel %vm436_vm13, %v1863_v25, 0.0  ;;  %1465 = vmatpush3.msra.mxu1 %v1110_v62  ;;  %v1107_v25 = vld [vmem:[#allocation3 + $0x10] sm:$0xff] }
 0x1be   : > { %864 = vrot.lane.b32.xlu0 %v843_v4, %s1678_s27  ;;  %845 = vrot.lane.b32.xlu1 %v843_v4, %s1677_s19  ;;  %v414_v6 = vpop.permute.xlu1 %413  ;;  %v1398_v4 = vld [vmem:[%s2327_s2 + $0x7] ss:$0 sm:$0xff] }
 0x1bf   : > { %v428_v9 = vsel %vm427_vm5, %v426_v5, %v414_v6  ;;  %1466 = vmatprep.subr.mxu1 %v1109_v63 }
 0x1c0   : > { %v911_v7 = vpop.permute.xlu0 %910  ;;  %1467 = vmatpush3.msra.mxu1 %v1109_v63 }
 0x1c1   : > { %v912_v8 = vsel %vm477_vm7, %v911_v7, %v1917_v2  ;;  %v1108_v7 = vld [vmem:[#allocation3 + $0x18] sm:$0xff] }
 0x1c2   : > { %933 = vrot.lane.b32.xlu0 %v912_v8, %s1678_s27  ;;  %914 = vrot.lane.b32.xlu1 %v912_v8, %s1677_s19  ;;  %v1106_v8 = vld [vmem:[#allocation3 + $0x8] sm:$0xff] }
 0x1c3   : > { %1468 = vmatprep.subr.mxu1 %v1108_v7 }
 0x1c4   : > { %v416_v10 = vpop.permute.xlu0 %415  ;;  %1469 = vmatpush3.msra.mxu1 %v1108_v7 }
 0x1c5   : > { %v2019_v11 = vsel %vm429_vm6, %v428_v9, %v416_v10  ;;  %v576_v9 = vmul.f32 %v1398_v4, %v570_v0  ;;  %v1399_v10 = vld [vmem:[%s2327_s2 + $0x8] ss:$0 sm:$0xff]  ;;  %1470 = vmatprep.subr.mxu1 %v1107_v25 }
 0x1c6   : > { %vm432_vm8 = vcmp.ge.s32.totalorder %v2019_v11, 1  ;;  %vm434_vm11 = vcmp.lt.s32.totalorder %v2019_v11, 7  ;;  %1471 = vmatpush3.msra.mxu1 %v1107_v25  ;;  %v1412_v25 = vld [vmem:[%s2327_s2 + $0x13] ss:$0 sm:$0xff]  ;;  %v1428_v11 = vld [vmem:[%s2327_s2 + $0x22] ss:$0 sm:$0xff] }
 0x1c7   : > { %vm2037_vm10 = vmand %vm431_vm9, %vm432_vm8  ;;  %1472 = vmatprep.subr.mxu1 %v1106_v8 }
 0x1c8   : > { %v948_v12 = vpop.permute.xlu0 %947  ;;  %vm2060_vm12 = vmand %vm431_vm9, %vm434_vm11  ;;  %1473 = vmatpush3.msra.mxu1 %v1106_v8 }
 0x1c9   : > { %v949_v13 = vsel %vm477_vm7, %v948_v12, %v1914_v1  ;;  %vm2089_vm14 = vmand %vm436_vm13, %vm432_vm8 }
 0x1ca   : > { %969 = vrot.lane.b32.xlu0 %v949_v13, %s1678_s27  ;;  %951 = vrot.lane.b32.xlu1 %v949_v13, %s1677_s19  ;;  %vm2112_vm15 = vmand %vm436_vm13, %vm434_vm11 }
 0x208   : > { %v486_v16 = vpop.permute.xlu1 %485 }
 0x209   : > { %v488_v22 = vsel %vm2037_vm10, %v486_v16, 0.0 }
 0x20a   : > { %v494_v24 = vmul.f32 %v1391_v15, %v488_v22 }
 0x20c   : > { %v495_v27 = vadd.f32 %v1390_v21, %v494_v24  ;;  %v505_v29 = vpop.permute.xlu1 %504  ;;  %v523_v31 = vpop.permute.xlu0 %522  ;;  %v639_v24 = vsel %vm431_vm9, %v1876_v34, 0.0  ;;  %v1404_v34 = vld [vmem:[%s2327_s2 + $0xc] ss:$0 sm:$0xff] }
 0x20d   : > { %v507_v20 = vsel %vm2060_vm12, %v505_v29, 0.0  ;;  %v525_v35 = vsel %vm432_vm8, %v523_v31, 0.0  ;;  %v1403_v31 = vld [vmem:[%s2327_s2 + $0xb] ss:$0 sm:$0xff] }
 0x20e   : > { %v503_v36 = vadd.f32 %v502_v28, %v495_v27  ;;  %v513_v37 = vmul.f32 %v1393_v26, %v507_v20  ;;  %v531_v40 = vmul.f32 %v1394_v32, %v525_v35  ;;  %v1402_v26 = vld [vmem:[%s2327_s2 + $0xa] ss:$0 sm:$0xff] }
 0x20f   : > { %v645_v29 = vmul.f32 %v1402_v26, %v639_v24 }
 0x210   : > { %v514_v39 = vadd.f32 %v513_v37, %v503_v36  ;;  %v985_v41 = vpop.permute.xlu1 %984  ;;  %v541_v45 = vpop.permute.xlu0 %540 }
 0x211   : > { %v986_v43 = vsel %vm477_vm7, %v985_v41, %v1924_v3  ;;  %v543_v49 = vsel %vm434_vm11, %v541_v45, 0.0  ;;  %v1405_v41 = vld [vmem:[%s2327_s2 + $0xd] ss:$0 sm:$0xff]  ;;  %v1406_v45 = vld [vmem:[%s2327_s2 + $0xe] ss:$0 sm:$0xff] }
 0x212   : > { %v532_v44 = vadd.f32 %v531_v40, %v514_v39  ;;  %1007 = vrot.lane.b32.xlu0 %v986_v43, %s1678_s27  ;;  %988 = vrot.lane.b32.xlu1 %v986_v43, %s1677_s19  ;;  %v549_v57 = vmul.f32 %v1396_v48, %v543_v49  ;;  %s1441_s19 = sshll.u32 %s1656_s24, 8  ;;  %s1679_s24 = smov [#allocation6]  }
 0x213   : > { %s2277_s13 = scalar_lea.hbm %s2331_s6, %s1441_s19  ;;  %s1588_s17 = sshll.u32 %s1679_s24, 4  ;;  %s1589_s17 = int_to_ptr.vmem [resolvable:$false] %s1588_s17 }
 0x214   : > { %v560_v47 = vpop.permute.xlu1 %559  ;;  %v539_v51 = vadd.f32 %v538_v46, %v532_v44  ;;  %v579_v6 = vpop.permute.xlu0 %578  ;;  %v681_v44 = vmul.f32 %v1405_v41, %v1871_v33  ;;  %v713_v33 = vsel %vm436_vm13, %v1882_v38, 0.0  ;;  %v1411_v38 = vld [vmem:[%s2327_s2 + $0x12] ss:$0 sm:$0xff]  ;;  %s1590_s18 = scalar_lea.vmem %s1589_s17, 512  ;;  %p1591_p0 = scmp.lt.s32.totalorder %s2272_s12, %s1589_s17 }
 0x215   : > { %v562_v56 = vsel %vm2089_vm14, %v560_v47, 0.0  ;;  %v581_v12 = vsel %vm2112_vm15, %v579_v6, 0.0  ;;  %p1592_p1 = scmp.lt.s32.totalorder %s1590_s18, %s1584_s16 }
 0x216   : > { %v550_v60 = vadd.f32 %v549_v57, %v539_v51  ;;  %v568_v61 = vmul.f32 %v1397_v54, %v562_v56  ;;  %v587_v16 = vmul.f32 %v1399_v10, %v581_v12  ;;  %v1407_v51 = vld [vmem:[%s2327_s2 + $0xf] ss:$0 sm:$0xff]  ;;  %v1408_v57 = vld [vmem:[%s2327_s2 + $0x10] ss:$0 sm:$0xff] }
 0x217   : > { %p1593_p2 = por %p1592_p1, %p1591_p0 }
 0x218   : > { %v569_v5 = vadd.f32 %v568_v61, %v550_v60  ;;  %v629_v15 = vpop.permute.xlu1 %628  ;;  %v648_v28 = vpop.permute.xlu0 %647  ;;  %v719_v60 = vmul.f32 %v1408_v57, %v713_v33  ;;  %v1409_v61 = vld [vmem:[%s2327_s2 + $0x11] ss:$0 sm:$0xff]  ;;  %v925_v33 = vsel %vm431_vm9, %v1917_v2, 0.0  ;;  %v1422_v57 = vld [vmem:[%s2327_s2 + $0x1c] ss:$0 sm:$0xff] }
 0x219   : > { %v631_v21 = vsel %vm2037_vm10, %v629_v15, 0.0  ;;  %v650_v20 = vsel %vm2060_vm12, %v648_v28, 0.0  ;;  %v1413_v15 = vld [vmem:[%s2327_s2 + $0x14] ss:$0 sm:$0xff]  ;;  %v1424_v2 = vld [vmem:[%s2327_s2 + $0x1e] ss:$0 sm:$0xff]  ;;  %p1594_p3 = pnand %p1593_p2, %p1587_p13 }
 0x21a   : > { %v577_v13 = vadd.f32 %v576_v9, %v569_v5  ;;  %v637_v23 = vmul.f32 %v1401_v19, %v631_v21  ;;  %v656_v36 = vmul.f32 %v1403_v31, %v650_v20  ;;  %v782_v9 = vsel %vm431_vm9, %v1899_v52, 0.0  ;;  %v1414_v52 = vld [vmem:[%s2327_s2 + $0x15] ss:$0 sm:$0xff]  ;;  %v1416_v20 = vld [vmem:[%s2327_s2 + $0x17] ss:$0 sm:$0xff] }
 0x21c   : > { %v588_v22 = vadd.f32 %v587_v16, %v577_v13  ;;  %v666_v35 = vpop.permute.xlu1 %665  ;;  %v684_v43 = vpop.permute.xlu0 %683  ;;  %v788_v13 = vmul.f32 %v1412_v25, %v782_v9  ;;  %v1426_v25 = vld [vmem:[%s2327_s2 + $0x20] ss:$0 sm:$0xff] }
 0x21d   : > { %v668_v37 = vsel %vm432_vm8, %v666_v35, 0.0  ;;  %v686_v46 = vsel %vm434_vm11, %v684_v43, 0.0 }
 0x21e   : > { %v638_v27 = vadd.f32 %v637_v23, %v588_v22  ;;  %v674_v40 = vmul.f32 %v1404_v34, %v668_v37  ;;  %v692_v49 = vmul.f32 %v1406_v45, %v686_v46  ;;  %v1417_v37 = vld [vmem:[%s2327_s2 + $0x18] ss:$0 sm:$0xff]  ;;  %v1419_v46 = vld [vmem:[%s2327_s2 + $0x1a] ss:$0 sm:$0xff] }
 0x220   : > { %v646_v32 = vadd.f32 %v645_v29, %v638_v27  ;;  %v703_v48 = vpop.permute.xlu1 %702  ;;  %v722_v59 = vpop.permute.xlu0 %721  ;;  %v1415_v27 = vld [vmem:[%s2327_s2 + $0x16] ss:$0 sm:$0xff] }
 0x221   : > { %v705_v18 = vsel %vm2089_vm14, %v703_v48, 0.0  ;;  %v724_v62 = vsel %vm2112_vm15, %v722_v59, 0.0  ;;  %v824_v31 = vmul.f32 %v1415_v27, %v1892_v50  ;;  %v856_v50 = vsel %vm436_vm13, %v1904_v55, 0.0  ;;  %v1421_v55 = vld [vmem:[%s2327_s2 + $0x1b] ss:$0 sm:$0xff] }
 0x222   : > { %v657_v39 = vadd.f32 %v656_v36, %v646_v32  ;;  %v711_v56 = vmul.f32 %v1407_v51, %v705_v18  ;;  %v730_v4 = vmul.f32 %v1409_v61, %v724_v62  ;;  %v1423_v61 = vld [vmem:[%s2327_s2 + $0x1d] ss:$0 sm:$0xff] }
 0x224   : > { %v675_v42 = vadd.f32 %v674_v40, %v657_v39  ;;  %v772_v0 = vpop.permute.xlu1 %771  ;;  %v791_v12 = vpop.permute.xlu0 %790 }
 0x225   : > { %v774_v5 = vsel %vm2037_vm10, %v772_v0, 0.0  ;;  %v793_v16 = vsel %vm2060_vm12, %v791_v12, 0.0 }
 0x226   : > { %v682_v47 = vadd.f32 %v681_v44, %v675_v42  ;;  %v780_v7 = vmul.f32 %v1411_v38, %v774_v5  ;;  %v799_v22 = vmul.f32 %v1413_v15, %v793_v16  ;;  %v1418_v42 = vld [vmem:[%s2327_s2 + $0x19] ss:$0 sm:$0xff] }
 0x227   : > { %v862_v45 = vmul.f32 %v1418_v42, %v856_v50 }
 0x228   : > { %v693_v54 = vadd.f32 %v692_v49, %v682_v47  ;;  %v809_v21 = vpop.permute.xlu1 %808  ;;  %v827_v29 = vpop.permute.xlu0 %826 }
 0x229   : > { %v811_v23 = vsel %vm432_vm8, %v809_v21, 0.0  ;;  %v829_v32 = vsel %vm434_vm11, %v827_v29, 0.0  ;;  %v1021_v29 = vld [vmem:[%s2329_s4 + $0x8] sm:$0xff] }
 0x22a   : > { %v712_v58 = vadd.f32 %v711_v56, %v693_v54  ;;  %v817_v26 = vmul.f32 %v1414_v52, %v811_v23  ;;  %v835_v34 = vmul.f32 %v1416_v20, %v829_v32  ;;  %v1429_v23 = vld [vmem:[%s2327_s2 + $0x23] ss:$0 sm:$0xff] }
 0x22c   : > { %v720_v63 = vadd.f32 %v719_v60, %v712_v58  ;;  %v931_v60 = vmul.f32 %v1422_v57, %v925_v33 }
 0x22e   : > { %v731_v6 = vadd.f32 %v730_v4, %v720_v63 }
 0x230   : > { %v781_v10 = vadd.f32 %v780_v7, %v731_v6  ;;  %v846_v36 = vpop.permute.xlu1 %845  ;;  %v865_v44 = vpop.permute.xlu0 %864  ;;  %v1425_v6 = vld [vmem:[%s2327_s2 + $0x1f] ss:$0 sm:$0xff] }
 0x231   : > { %v848_v39 = vsel %vm2089_vm14, %v846_v36, 0.0  ;;  %v867_v47 = vsel %vm2112_vm15, %v865_v44, 0.0  ;;  %v967_v30 = vmul.f32 %v1425_v6, %v1914_v1  ;;  %v999_v1 = vsel %vm436_vm13, %v1924_v3, 0.0 }
 0x232   : > { %v789_v19 = vadd.f32 %v788_v13, %v781_v10  ;;  %v854_v41 = vmul.f32 %v1417_v37, %v848_v39  ;;  %v873_v51 = vmul.f32 %v1419_v46, %v867_v47  ;;  %v1427_v13 = vld [vmem:[%s2327_s2 + $0x21] ss:$0 sm:$0xff]  ;;  %v1005_v53 = vmul.f32 %v1428_v11, %v999_v1 }
 0x234   : > { %v800_v24 = vadd.f32 %v799_v22, %v789_v19  ;;  %v915_v49 = vpop.permute.xlu1 %914  ;;  %v934_v59 = vpop.permute.xlu0 %933 }
 0x235   : > { %v917_v18 = vsel %vm2037_vm10, %v915_v49, 0.0  ;;  %v936_v17 = vsel %vm2060_vm12, %v934_v59, 0.0 }
 0x236   : > { %v818_v28 = vadd.f32 %v817_v26, %v800_v24  ;;  %v923_v56 = vmul.f32 %v1421_v55, %v917_v18  ;;  %v942_v0 = vmul.f32 %v1423_v61, %v936_v17 }
 0x238   : > { %v825_v35 = vadd.f32 %v824_v31, %v818_v28  ;;  %v1105_v31 = vld [vmem:[#allocation3] sm:$0xff] }
 0x239   : > { %1474 = vmatprep.subr.mxu1 %v1105_v31 }
 0x23a   : > { %v836_v40 = vadd.f32 %v835_v34, %v825_v35  ;;  %1475 = vmatpush3.msra.mxu1 %v1105_v31  ;;  %v1196_v35 = vld [vmem:[%s373_s30 + $0x8] sm:$0xff]  ;;  %v1195_v34 = vld [vmem:[%s373_s30] sm:$0xff] }
 0x23c   : > { %v855_v43 = vadd.f32 %v854_v41, %v836_v40  ;;  %v952_v63 = vpop.permute.xlu1 %951  ;;  %v970_v9 = vpop.permute.xlu0 %969 }
 0x23d   : > { %v954_v4 = vsel %vm432_vm8, %v952_v63, 0.0  ;;  %v972_v10 = vsel %vm434_vm11, %v970_v9, 0.0 }
 0x23e   : > { %v863_v48 = vadd.f32 %v862_v45, %v855_v43  ;;  %v960_v5 = vmul.f32 %v1424_v2, %v954_v4  ;;  %v978_v15 = vmul.f32 %v1426_v25, %v972_v10 }
 0x240   : > { %v874_v54 = vadd.f32 %v873_v51, %v863_v48 }
 0x242   : > { %v924_v58 = vadd.f32 %v923_v56, %v874_v54 }
 0x244   : > { %v932_v62 = vadd.f32 %v931_v60, %v924_v58 }
 0x246   : > { %v943_v38 = vadd.f32 %v942_v0, %v932_v62 }
 0x248   : > { %v961_v7 = vadd.f32 %v960_v5, %v943_v38 }
 0x24a   : > { %v968_v12 = vadd.f32 %v967_v30, %v961_v7 }
 0x24c   : > { %v979_v22 = vadd.f32 %v978_v15, %v968_v12 }
 0x284   : > { %v989_v16 = vpop.permute.xlu1 %988  ;;  %v1008_v19 = vpop.permute.xlu0 %1007 }
 0x285   : > { %v991_v21 = vsel %vm2089_vm14, %v989_v16, 0.0  ;;  %v1010_v24 = vsel %vm2112_vm15, %v1008_v19, 0.0 }
 0x286   : > { %v997_v52 = vmul.f32 %v1427_v13, %v991_v21  ;;  %v1016_v28 = vmul.f32 %v1429_v23, %v1010_v24 }
 0x288   : > { %v998_v26 = vadd.f32 %v997_v52, %v979_v22 }
 0x28a   : > { %v1006_v27 = vadd.f32 %v1005_v53, %v998_v26 }
 0x28c   : > { %v1017_v14 = vadd.f32 %v1016_v28, %v1006_v27 }
 0x28e   : > { %1019 = vst.msk [vmem:[#allocation2] sm:$0xff] %vm1018_vm1, %v1017_v14 }
 0x295   : > { %v1022_v3 = vld [vmem:[#allocation2] sm:$0xff] }
 0x296   : > { %1455 = vmatprep.subr.mxu0 %v1022_v3 }
 0x297   : > { %1456 = vmatpush3.msra.mxu0 %v1022_v3 }
 0x298   : > { %1458 = vmatmul.mubr.msk.f32.vlgmr.msra.gmra.mxu0 %vm417_vm0, %v1021_v29 }
 0x358   : > { %v1459_v20 = vpop.f32.mrf.mxu0 }
 0x35a   : > { %v1096_v32 = vpop.f32.mrf.mxu0 }
 0x35b   : > { %1476 = vmatprep.mubr.msk.f32.mxu1 %vm1018_vm1, %v1096_v32 }
 0x35c   : > { %1477 = vmatmul.mubr.msk.f32.vlgmr.msra.gmra.mxu1 %vm1018_vm1, %v1459_v20 }
 0x41c   : > { %v1478_v36 = vpop.f32.mrf.mxu1 }
 0x41d   : > { %v1198_v37 = vmul.f32 %v1478_v36, %v1196_v35 }
 0x41e   : > { %v1186_v39 = vpop.f32.mrf.mxu1 }
 0x41f   : > { %1200 = vst [vmem:[%s360_s8 + $0x8] sm:$0xff] %v1198_v37  ;;  %v1197_v40 = vmul.f32 %v1195_v34, %v1186_v39 }
 0x421   : > { %1199 = vst [vmem:[%s360_s8] sm:$0xff] %v1197_v40 }
 0x422   : > { %1597 = shalt.err (!%p1594_p3)
}
 0x423   : > { %s1598_s15 = scalar_lea.hbm %s2277_s13, 256  ;;  %s1602_s8 = scalar_lea.hbm %s2331_s6, 512 }
 0x424   : > { %p1599_p5 = scmp.ne.s32.totalorder %s2277_s13, %s1598_s15  ;;  %p1603_p9 = scmp.lt.s32.totalorder %s2277_s13, %s2331_s6 }
 0x425   : > { %p1604_p12 = scmp.lt.s32.totalorder %s1602_s8, %s1598_s15 }
 0x426   : > { %p1600_p6 = pnand %p1599_p5, %p1756_p4 }
 0x427   : > { %p1605_p10 = por %p1604_p12, %p1603_p9 }
 0x428   : > { %p1601_p7 = pneg %p1600_p6 }
 0x42a   : > { %p1606_p11 = pnand %p1605_p10, %p1601_p7 }
 0x42c   : > { %1609 = shalt.err (!%p1606_p11)
}
 0x42d   : > { %s1680_s27 = smov 128  }
 0x42e   : > { %1483 = dma.vmem_to_hbm [thread:$0]  (%p1756_p4), %s2272_s12, 256, %s2277_s13, %s2279_s14, %s1680_s27, %s1680_s27, %s1669_s11  }
 0x42f PF: > { %p1495_p13 = scmp.ge.s32.totalorder %s1664_s26, 2  ;;  %s1234_s16 = sand.u32 1, %s1644_s21  }
 0x430   : > { %s1235_s24 = scalar_lea.sflag [#allocation5], %s1234_s16 }
 0x431   : > { %p1490_p0 = pnand %p1495_p13, %p1763_p8 }
 0x433   : > { %p1491_p1 = pneg %p1490_p0 }
 0x435   : > { %1639 = dma.done.wait (%p1491_p1), %s1235_s24, 256  }
 0x436   : > { %1641 = vsyncadd (%p1491_p1), %s1235_s24, 4294967040  ;;  %s20_s26 = sadd.s32 1, %s1664_s26   ;;  %s2344_s21 = smov %s1648_s22 }
 0x437   : > { %p17_p2 = scmp.ge.s32.totalorder %s20_s26, 4   ;;  %s2345_s22 = smov %s1652_s23 }
 0x438   : > { %s2346_s23 = smov %s1769_s10  ;;  %s2347_s24 = smov %s1660_s25 }
 0x439   : > { %s2348_s25 = smov %s2350_s29  ;;  %19 = sbr.rel (!%p17_p2) target bundleno = 5 (0x5), region = 103 }
 0x43e   :  { %1240 = vsyncpa [#allocation4], 1 }
 0x43f   :  { %1242 = vsyncpa [#allocation4 + $0x1], 1 }
 0x440   :  { %1243 = vsyncpa [#allocation5], 1 }
 0x441   :  { %1245 = vsyncpa [#allocation5 + $0x1], 1 }

</bundles_post_ra>
